<compile_context>
chip_gen: v7x
topology: tpu7x:2x2x1
jax: 0.10.0
libtpu: 0.0.40
codegen_flags: <defaults>
</compile_context>

<pallas_src>
import functools

import jax
import jax.numpy as jnp
from jax import lax
from jax.experimental import pallas as pl
from jax.experimental.pallas import tpu as pltpu

NEG_INF = -9e15     # matches the PyTorch code's zero_vec value
D_PAD = 256         # 200 features padded to a lane-dense multiple of 128


def _leaky_relu(x, alpha):
    return jnp.where(x > 0, x, alpha * x)


def _dot_last(a, b):
    """(1, D) . (M, D)^T -> (1, M) without materializing a transpose."""
    return lax.dot_general(a, b, dimension_numbers=(((1,), (1,)), ((), ())),
                           preferred_element_type=jnp.float32)


def _hgat_layer(x, w_ref, w2_ref, w3_ref, att_ref, mask_en, mask_ne, *, alpha, concat):
    """One HyperGraphAttentionLayerSparse forward on in-VMEM f32 values.

    x       : (N, D_PAD) f32 node features.
    w_ref   : None (transfer=False) or (D_PAD, D_PAD) f32 'weight'.
    w2_ref  : (D_PAD, D_PAD) f32 'weight2';  w3_ref: (D_PAD, D_PAD) f32 'weight3'.
    att_ref : (8, D_PAD) f32; rows 0/1/2 = a_x / a2_x / a2_e (lane-major),
              element [3, 0] = s_q = word_context . a_q  (precomputed).
    mask_en : (E, N) bool;  mask_ne : (N, E) bool.
    """
    x4 = jnp.dot(x, w2_ref[...], preferred_element_type=jnp.float32)           # (N, D)
    if w_ref is None:
        xt = x                                                                 # transfer=False
    else:
        xt = jnp.dot(x, w_ref[...], preferred_element_type=jnp.float32)        # (N, D)

    a_x = att_ref[0:1, :]        # (1, D) f32
    a2_x = att_ref[1:2, :]
    a2_e = att_ref[2:3, :]
    s_q = att_ref[3:4, 0:1]      # (1, 1)  = word_context . a_q (hoisted to wrapper)

    # ---- edge-level attention: softmax over nodes per hyperedge, (E, N) layout ----
    s_x = _dot_last(a_x, x4)                                                   # (1, N)
    score1 = _leaky_relu(s_q + s_x, alpha)                                     # (1, N)
    att1 = jnp.where(mask_en, jnp.broadcast_to(score1, mask_en.shape), NEG_INF)
    att1 = att1 - jnp.max(att1, axis=-1, keepdims=True)
    p1 = jnp.exp(att1)
    att_edge = p1 / jnp.sum(p1, axis=-1, keepdims=True)                        # (E, N)

    edge = jnp.dot(att_edge, xt, preferred_element_type=jnp.float32)           # (E, D)

    # ---- node-level attention: softmax over hyperedges per node, (N, E) layout ----
    edge4 = jnp.dot(edge, w3_ref[...], preferred_element_type=jnp.float32)     # (E, D)
    s2_x = jnp.sum(x4 * a2_x, axis=-1, keepdims=True)                          # (N, 1)
    s2_e = _dot_last(a2_e, edge4)                                              # (1, E)
    score2 = _leaky_relu(s2_x + s2_e, alpha)                                   # (N, E)
    att2 = jnp.where(mask_ne, score2, NEG_INF)
    att2 = att2 - jnp.max(att2, axis=-1, keepdims=True)
    p2 = jnp.exp(att2)
    att_node = p2 / jnp.sum(p2, axis=-1, keepdims=True)                        # (N, E)

    node = jnp.dot(att_node, edge, preferred_element_type=jnp.float32)         # (N, D)

    if concat:
        node = jnp.where(node > 0, node, jnp.exp(node) - 1.0)                  # F.elu (alpha=1)
    return node


def _document_graph_kernel(alpha,
                           idx_ref, emb_ref, adj_en_ref, adj_ne_ref,
                           w2_1_ref, w3_1_ref, att1_ref,
                           w_2_ref, w2_2_ref, w3_2_ref, att2_ref,
                           out_ref):
    n = idx_ref.shape[0]
    v = emb_ref.shape[0]

    # adj uploaded once; mask computed once and shared by both layers.
    mask_en = adj_en_ref[...] > 0.0      # (E, N)
    mask_ne = adj_ne_ref[...] > 0.0      # (N, E)

    # Embedding lookup fused in as an exact one-hot matmul.
    idx = idx_ref[...]                                            # (N, 1) int32
    iota = lax.broadcasted_iota(jnp.int32, (n, v), 1)
    onehot = (idx == iota).astype(jnp.float32)                    # (N, V_pad)
    x = jnp.dot(onehot, emb_ref[...], preferred_element_type=jnp.float32)    # (N, D)

    # gat1: transfer=False, concat=True ; gat2: transfer=True, concat=False.
    x = _hgat_layer(x, None, w2_1_ref, w3_1_ref, att1_ref,
                    mask_en, mask_ne, alpha=alpha, concat=True)
    x = _hgat_layer(x, w_2_ref, w2_2_ref, w3_2_ref, att2_ref,
                    mask_en, mask_ne, alpha=alpha, concat=False)

    out_ref[...] = x.astype(out_ref.dtype)


# --------------------------- host-side wrappers ---------------------------

def _pad2(a, rows, cols):
    r, c = a.shape
    return jnp.pad(a, ((0, rows - r), (0, cols - c)))


def init_layer_params(key, d_in, d_out, transfer):
    """Same parameterization as the PyTorch layer (f32, unpadded)."""
    ks = jax.random.split(key, 6)
    s = 1.0 / jnp.sqrt(jnp.float32(d_out))
    a = jax.random.uniform(ks[0], (2 * d_out, 1), minval=-s, maxval=s, dtype=jnp.float32)
    a2 = jax.random.uniform(ks[1], (2 * d_out, 1), minval=-s, maxval=s, dtype=jnp.float32)
    p = {
        "W2": jax.random.uniform(ks[2], (d_in, d_out), minval=-s, maxval=s, dtype=jnp.float32),
        "W3": jax.random.uniform(ks[3], (d_out, d_out), minval=-s, maxval=s, dtype=jnp.float32),
        # a / a2 split into the word-context half and the node/edge half
        "a_q": a[:d_out, :], "a_x": a[d_out:, :],
        "a2_x": a2[:d_out, :], "a2_e": a2[d_out:, :],
        # nn.Embedding(1, d_out) word-context vector
        "wc": jax.random.normal(ks[4], (1, d_out), dtype=jnp.float32),
    }
    if transfer:
        p["W"] = jax.random.uniform(ks[5], (d_in, d_out), minval=-s, maxval=s, dtype=jnp.float32)
    return p


def pack_layer_params(p, transfer):
    """One-time, parameter-only preprocessing: pad to 256 lanes, lane-major
    attention rows, and hoist s_q = wc . a_q out of the kernel."""
    d_in, d_out = p["W2"].shape
    if not transfer:
        assert d_in == d_out, "transfer=False requires d_in == d_out (xt = x)"
    packed = {
        "W2": _pad2(p["W2"], D_PAD, D_PAD).astype(jnp.float32),
        "W3": _pad2(p["W3"], D_PAD, D_PAD).astype(jnp.float32),
    }
    s_q = jnp.dot(p["wc"], p["a_q"])[0, 0]
    att = jnp.zeros((8, D_PAD), jnp.float32)
    att = att.at[0, :d_out].set(p["a_x"][:, 0])
    att = att.at[1, :d_out].set(p["a2_x"][:, 0])
    att = att.at[2, :d_out].set(p["a2_e"][:, 0])
    att = att.at[3, 0].set(s_q)
    packed["att"] = att
    if transfer:
        packed["W"] = _pad2(p["W"], D_PAD, D_PAD).astype(jnp.float32)
    return packed


def pad_embedding(emb_table):
    """Pad vocab to a multiple of 128 (lane-dense one-hot) and feats to D_PAD."""
    v = emb_table.shape[0]
    v_pad = max(128, ((v + 127) // 128) * 128)
    return _pad2(emb_table.astype(jnp.float32), v_pad, D_PAD)


def document_graph_forward(hkg_nodes, HT, emb_pad, packed1, packed2, *, alpha, d_out):
    """DocumentGraph.forward as one fused pallas_call (embedding + gat1 + gat2)."""
    n = hkg_nodes.shape[0]
    adj = HT[0].astype(jnp.float32)        # (E, N)   batch=1 squeezed
    adj_t = adj.T                          # (N, E)   one-time wrapper transpose
    idx = hkg_nodes.astype(jnp.int32).reshape(n, 1)

    ins = (idx, emb_pad, adj, adj_t,
           packed1["W2"], packed1["W3"], packed1["att"],
           packed2["W"], packed2["W2"], packed2["W3"], packed2["att"])
    vmem = pl.BlockSpec(memory_space=pltpu.MemorySpace.VMEM)
    out = pl.pallas_call(
        functools.partial(_document_graph_kernel, alpha),
        out_shape=jax.ShapeDtypeStruct((n, D_PAD), jnp.float32),   # lane-dense output
        in_specs=[vmem] * len(ins),
        out_specs=vmem,
    )(*ins)
    # TODO(synk): to batch many documents, add a leading grid axis over docs with
    # dimension_semantics=("parallel",) so both v7x TensorCores are used.
    return out[None, :, :d_out]            # (1, N, 200): drop the lane padding last


if __name__ == "__main__":
    key = jax.random.PRNGKey(0)
    k_emb, k_nodes, k_ht, k_l1, k_l2 = jax.random.split(key, 5)

    V = 50          # hypergraph-node vocab size for the embedding
    N = 64          # number of nodes in this document hypergraph
    E = 16          # number of hyperedges
    D = 200         # module hard-codes initial_feature = hidden_size = 200
    alpha = 0.2     # args.alpha (LeakyReLU slope)

    emb_table = (0.1 * jax.random.normal(k_emb, (V, D))).astype(jnp.float32)
    hkg_nodes = jax.random.randint(k_nodes, (N,), 0, V)
    HT = (jax.random.uniform(k_ht, (1, E, N)) < 0.25).astype(jnp.float32)

    params1 = init_layer_params(k_l1, D, D, transfer=False)   # gat1: 200 -> 200
    params2 = init_layer_params(k_l2, D, D, transfer=True)    # gat2: 200 -> 200

    # One-time parameter packing (padding / lane-major attention rows / s_q).
    emb_pad = pad_embedding(emb_table)
    packed1 = pack_layer_params(params1, transfer=False)
    packed2 = pack_layer_params(params2, transfer=True)

    fwd = jax.jit(functools.partial(document_graph_forward, alpha=alpha, d_out=D))
    out = fwd(hkg_nodes, HT, emb_pad, packed1, packed2)
    jax.block_until_ready(out)
    assert out.shape == (1, N, D)
    print("KERNEL_OK")
</pallas_src>

<mosaic_0001>
module attributes {stable_mosaic.version = 11 : i64} {
  func.func @_document_graph_kernel(%arg0: memref<64x1xi32, #tpu.memory_space<vmem>>, %arg1: memref<128x256xf32, #tpu.memory_space<vmem>>, %arg2: memref<16x64xf32, #tpu.memory_space<vmem>>, %arg3: memref<64x16xf32, #tpu.memory_space<vmem>>, %arg4: memref<256x256xf32, #tpu.memory_space<vmem>>, %arg5: memref<256x256xf32, #tpu.memory_space<vmem>>, %arg6: memref<8x256xf32, #tpu.memory_space<vmem>>, %arg7: memref<256x256xf32, #tpu.memory_space<vmem>>, %arg8: memref<256x256xf32, #tpu.memory_space<vmem>>, %arg9: memref<256x256xf32, #tpu.memory_space<vmem>>, %arg10: memref<8x256xf32, #tpu.memory_space<vmem>>, %arg11: memref<64x256xf32, #tpu.memory_space<vmem>>) attributes {dimension_semantics = [], scalar_prefetch = 0 : i64, scratch_operands = 0 : i64, tpu.core_type = #tpu.core_type<tc>} {
    %c0 = arith.constant 0 : index
    %c0_0 = arith.constant 0 : index
    %0 = vector.load %arg2[%c0, %c0_0] : memref<16x64xf32, #tpu.memory_space<vmem>>, vector<16x64xf32>
    %cst = arith.constant 0.000000e+00 : f32
    %1 = vector.broadcast %cst : f32 to vector<16x64xf32>
    %2 = arith.cmpf ogt, %0, %1 : vector<16x64xf32>
    %c0_1 = arith.constant 0 : index
    %c0_2 = arith.constant 0 : index
    %3 = vector.load %arg3[%c0_1, %c0_2] : memref<64x16xf32, #tpu.memory_space<vmem>>, vector<64x16xf32>
    %cst_3 = arith.constant 0.000000e+00 : f32
    %4 = vector.broadcast %cst_3 : f32 to vector<64x16xf32>
    %5 = arith.cmpf ogt, %3, %4 : vector<64x16xf32>
    %c0_4 = arith.constant 0 : index
    %c0_5 = arith.constant 0 : index
    %6 = vector.load %arg0[%c0_4, %c0_5] : memref<64x1xi32, #tpu.memory_space<vmem>>, vector<64x1xi32>
    %7 = tpu.iota {dimensions = array<i32: 1>} : vector<64x128xi32>
    %8 = vector.broadcast %6 : vector<64x1xi32> to vector<64x128xi32>
    %9 = arith.cmpi eq, %8, %7 : vector<64x128xi32>
    %10 = arith.extui %9 : vector<64x128xi1> to vector<64x128xi32>
    %11 = arith.sitofp %10 : vector<64x128xi32> to vector<64x128xf32>
    %c0_6 = arith.constant 0 : index
    %c0_7 = arith.constant 0 : index
    %12 = vector.load %arg1[%c0_6, %c0_7] : memref<128x256xf32, #tpu.memory_space<vmem>>, vector<128x256xf32>
    %cst_8 = arith.constant dense<0.000000e+00> : vector<64x256xf32>
    %13 = tpu.matmul %11, %12, %cst_8 {dimension_numbers = #tpu.dot_dimension_numbers<[1], [0], [0], [1], [0, 0, 1, 1], [], []>} : vector<64x128xf32>, vector<128x256xf32>, vector<64x256xf32> -> vector<64x256xf32>
    %c0_9 = arith.constant 0 : index
    %c0_10 = arith.constant 0 : index
    %14 = vector.load %arg4[%c0_9, %c0_10] : memref<256x256xf32, #tpu.memory_space<vmem>>, vector<256x256xf32>
    %cst_11 = arith.constant dense<0.000000e+00> : vector<64x256xf32>
    %15 = tpu.matmul %13, %14, %cst_11 {dimension_numbers = #tpu.dot_dimension_numbers<[1], [0], [0], [1], [0, 0, 1, 1], [], []>} : vector<64x256xf32>, vector<256x256xf32>, vector<64x256xf32> -> vector<64x256xf32>
    %c0_12 = arith.constant 0 : index
    %c0_13 = arith.constant 0 : index
    %16 = vector.load %arg6[%c0_12, %c0_13] : memref<8x256xf32, #tpu.memory_space<vmem>>, vector<1x256xf32>
    %c1 = arith.constant 1 : index
    %c0_14 = arith.constant 0 : index
    %17 = vector.load %arg6[%c1, %c0_14] : memref<8x256xf32, #tpu.memory_space<vmem>>, vector<1x256xf32>
    %c2 = arith.constant 2 : index
    %c0_15 = arith.constant 0 : index
    %18 = vector.load %arg6[%c2, %c0_15] : memref<8x256xf32, #tpu.memory_space<vmem>>, vector<1x256xf32>
    %c3 = arith.constant 3 : index
    %c0_16 = arith.constant 0 : index
    %19 = vector.load %arg6[%c3, %c0_16] : memref<8x256xf32, #tpu.memory_space<vmem>>, vector<1x1xf32>
    %cst_17 = arith.constant dense<0.000000e+00> : vector<1x64xf32>
    %20 = tpu.matmul %16, %15, %cst_17 {dimension_numbers = #tpu.dot_dimension_numbers<[1], [1], [0], [0], [0, 0, 1, 0], [], []>} : vector<1x256xf32>, vector<64x256xf32>, vector<1x64xf32> -> vector<1x64xf32>
    %21 = vector.broadcast %19 : vector<1x1xf32> to vector<1x64xf32>
    %22 = arith.addf %21, %20 : vector<1x64xf32>
    %cst_18 = arith.constant 0.000000e+00 : f32
    %23 = vector.broadcast %cst_18 : f32 to vector<1x64xf32>
    %24 = arith.cmpf ogt, %22, %23 : vector<1x64xf32>
    %cst_19 = arith.constant 2.000000e-01 : f32
    %25 = vector.broadcast %cst_19 : f32 to vector<1x64xf32>
    %26 = arith.mulf %25, %22 : vector<1x64xf32>
    %27 = arith.select %24, %22, %26 : vector<1x64xi1>, vector<1x64xf32>
    %28 = vector.shape_cast %27 : vector<1x64xf32> to vector<1x64xf32>
    %29 = vector.broadcast %28 : vector<1x64xf32> to vector<16x64xf32>
    %cst_20 = arith.constant -9.000000e+15 : f32
    %30 = vector.broadcast %cst_20 : f32 to vector<16x64xf32>
    %31 = arith.select %2, %29, %30 : vector<16x64xi1>, vector<16x64xf32>
    %cst_21 = arith.constant dense<0xFF800000> : vector<16xf32>
    %32 = vector.multi_reduction <maximumf>, %31, %cst_21 [1] : vector<16x64xf32> to vector<16xf32>
    %33 = vector.shape_cast %32 : vector<16xf32> to vector<16x1xf32>
    %34 = vector.broadcast %33 : vector<16x1xf32> to vector<16x64xf32>
    %35 = arith.subf %31, %34 : vector<16x64xf32>
    %36 = math.exp %35 : vector<16x64xf32>
    %cst_22 = arith.constant dense<0.000000e+00> : vector<16xf32>
    %37 = vector.multi_reduction <add>, %36, %cst_22 [1] : vector<16x64xf32> to vector<16xf32>
    %38 = vector.shape_cast %37 : vector<16xf32> to vector<16x1xf32>
    %39 = vector.broadcast %38 : vector<16x1xf32> to vector<16x64xf32>
    %40 = arith.divf %36, %39 : vector<16x64xf32>
    %cst_23 = arith.constant dense<0.000000e+00> : vector<16x256xf32>
    %41 = tpu.matmul %40, %13, %cst_23 {dimension_numbers = #tpu.dot_dimension_numbers<[1], [0], [0], [1], [0, 0, 1, 1], [], []>} : vector<16x64xf32>, vector<64x256xf32>, vector<16x256xf32> -> vector<16x256xf32>
    %c0_24 = arith.constant 0 : index
    %c0_25 = arith.constant 0 : index
    %42 = vector.load %arg5[%c0_24, %c0_25] : memref<256x256xf32, #tpu.memory_space<vmem>>, vector<256x256xf32>
    %cst_26 = arith.constant dense<0.000000e+00> : vector<16x256xf32>
    %43 = tpu.matmul %41, %42, %cst_26 {dimension_numbers = #tpu.dot_dimension_numbers<[1], [0], [0], [1], [0, 0, 1, 1], [], []>} : vector<16x256xf32>, vector<256x256xf32>, vector<16x256xf32> -> vector<16x256xf32>
    %44 = vector.broadcast %17 : vector<1x256xf32> to vector<64x256xf32>
    %45 = arith.mulf %15, %44 : vector<64x256xf32>
    %cst_27 = arith.constant dense<0.000000e+00> : vector<64xf32>
    %46 = vector.multi_reduction <add>, %45, %cst_27 [1] : vector<64x256xf32> to vector<64xf32>
    %47 = vector.shape_cast %46 : vector<64xf32> to vector<64x1xf32>
    %cst_28 = arith.constant dense<0.000000e+00> : vector<1x16xf32>
    %48 = tpu.matmul %18, %43, %cst_28 {dimension_numbers = #tpu.dot_dimension_numbers<[1], [1], [0], [0], [0, 0, 1, 0], [], []>} : vector<1x256xf32>, vector<16x256xf32>, vector<1x16xf32> -> vector<1x16xf32>
    %49 = vector.broadcast %47 : vector<64x1xf32> to vector<64x16xf32>
    %50 = vector.broadcast %48 : vector<1x16xf32> to vector<64x16xf32>
    %51 = arith.addf %49, %50 : vector<64x16xf32>
    %cst_29 = arith.constant 0.000000e+00 : f32
    %52 = vector.broadcast %cst_29 : f32 to vector<64x16xf32>
    %53 = arith.cmpf ogt, %51, %52 : vector<64x16xf32>
    %cst_30 = arith.constant 2.000000e-01 : f32
    %54 = vector.broadcast %cst_30 : f32 to vector<64x16xf32>
    %55 = arith.mulf %54, %51 : vector<64x16xf32>
    %56 = arith.select %53, %51, %55 : vector<64x16xi1>, vector<64x16xf32>
    %cst_31 = arith.constant -9.000000e+15 : f32
    %57 = vector.broadcast %cst_31 : f32 to vector<64x16xf32>
    %58 = arith.select %5, %56, %57 : vector<64x16xi1>, vector<64x16xf32>
    %cst_32 = arith.constant dense<0xFF800000> : vector<64xf32>
    %59 = vector.multi_reduction <maximumf>, %58, %cst_32 [1] : vector<64x16xf32> to vector<64xf32>
    %60 = vector.shape_cast %59 : vector<64xf32> to vector<64x1xf32>
    %61 = vector.broadcast %60 : vector<64x1xf32> to vector<64x16xf32>
    %62 = arith.subf %58, %61 : vector<64x16xf32>
    %63 = math.exp %62 : vector<64x16xf32>
    %cst_33 = arith.constant dense<0.000000e+00> : vector<64xf32>
    %64 = vector.multi_reduction <add>, %63, %cst_33 [1] : vector<64x16xf32> to vector<64xf32>
    %65 = vector.shape_cast %64 : vector<64xf32> to vector<64x1xf32>
    %66 = vector.broadcast %65 : vector<64x1xf32> to vector<64x16xf32>
    %67 = arith.divf %63, %66 : vector<64x16xf32>
    %cst_34 = arith.constant dense<0.000000e+00> : vector<64x256xf32>
    %68 = tpu.matmul %67, %41, %cst_34 {dimension_numbers = #tpu.dot_dimension_numbers<[1], [0], [0], [1], [0, 0, 1, 1], [], []>} : vector<64x16xf32>, vector<16x256xf32>, vector<64x256xf32> -> vector<64x256xf32>
    %cst_35 = arith.constant 0.000000e+00 : f32
    %69 = vector.broadcast %cst_35 : f32 to vector<64x256xf32>
    %70 = arith.cmpf ogt, %68, %69 : vector<64x256xf32>
    %71 = math.exp %68 : vector<64x256xf32>
    %cst_36 = arith.constant 1.000000e+00 : f32
    %72 = vector.broadcast %cst_36 : f32 to vector<64x256xf32>
    %73 = arith.subf %71, %72 : vector<64x256xf32>
    %74 = arith.select %70, %68, %73 : vector<64x256xi1>, vector<64x256xf32>
    %c0_37 = arith.constant 0 : index
    %c0_38 = arith.constant 0 : index
    %75 = vector.load %arg8[%c0_37, %c0_38] : memref<256x256xf32, #tpu.memory_space<vmem>>, vector<256x256xf32>
    %cst_39 = arith.constant dense<0.000000e+00> : vector<64x256xf32>
    %76 = tpu.matmul %74, %75, %cst_39 {dimension_numbers = #tpu.dot_dimension_numbers<[1], [0], [0], [1], [0, 0, 1, 1], [], []>} : vector<64x256xf32>, vector<256x256xf32>, vector<64x256xf32> -> vector<64x256xf32>
    %c0_40 = arith.constant 0 : index
    %c0_41 = arith.constant 0 : index
    %77 = vector.load %arg7[%c0_40, %c0_41] : memref<256x256xf32, #tpu.memory_space<vmem>>, vector<256x256xf32>
    %cst_42 = arith.constant dense<0.000000e+00> : vector<64x256xf32>
    %78 = tpu.matmul %74, %77, %cst_42 {dimension_numbers = #tpu.dot_dimension_numbers<[1], [0], [0], [1], [0, 0, 1, 1], [], []>} : vector<64x256xf32>, vector<256x256xf32>, vector<64x256xf32> -> vector<64x256xf32>
    %c0_43 = arith.constant 0 : index
    %c0_44 = arith.constant 0 : index
    %79 = vector.load %arg10[%c0_43, %c0_44] : memref<8x256xf32, #tpu.memory_space<vmem>>, vector<1x256xf32>
    %c1_45 = arith.constant 1 : index
    %c0_46 = arith.constant 0 : index
    %80 = vector.load %arg10[%c1_45, %c0_46] : memref<8x256xf32, #tpu.memory_space<vmem>>, vector<1x256xf32>
    %c2_47 = arith.constant 2 : index
    %c0_48 = arith.constant 0 : index
    %81 = vector.load %arg10[%c2_47, %c0_48] : memref<8x256xf32, #tpu.memory_space<vmem>>, vector<1x256xf32>
    %c3_49 = arith.constant 3 : index
    %c0_50 = arith.constant 0 : index
    %82 = vector.load %arg10[%c3_49, %c0_50] : memref<8x256xf32, #tpu.memory_space<vmem>>, vector<1x1xf32>
    %cst_51 = arith.constant dense<0.000000e+00> : vector<1x64xf32>
    %83 = tpu.matmul %79, %76, %cst_51 {dimension_numbers = #tpu.dot_dimension_numbers<[1], [1], [0], [0], [0, 0, 1, 0], [], []>} : vector<1x256xf32>, vector<64x256xf32>, vector<1x64xf32> -> vector<1x64xf32>
    %84 = vector.broadcast %82 : vector<1x1xf32> to vector<1x64xf32>
    %85 = arith.addf %84, %83 : vector<1x64xf32>
    %cst_52 = arith.constant 0.000000e+00 : f32
    %86 = vector.broadcast %cst_52 : f32 to vector<1x64xf32>
    %87 = arith.cmpf ogt, %85, %86 : vector<1x64xf32>
    %cst_53 = arith.constant 2.000000e-01 : f32
    %88 = vector.broadcast %cst_53 : f32 to vector<1x64xf32>
    %89 = arith.mulf %88, %85 : vector<1x64xf32>
    %90 = arith.select %87, %85, %89 : vector<1x64xi1>, vector<1x64xf32>
    %91 = vector.shape_cast %90 : vector<1x64xf32> to vector<1x64xf32>
    %92 = vector.broadcast %91 : vector<1x64xf32> to vector<16x64xf32>
    %cst_54 = arith.constant -9.000000e+15 : f32
    %93 = vector.broadcast %cst_54 : f32 to vector<16x64xf32>
    %94 = arith.select %2, %92, %93 : vector<16x64xi1>, vector<16x64xf32>
    %cst_55 = arith.constant dense<0xFF800000> : vector<16xf32>
    %95 = vector.multi_reduction <maximumf>, %94, %cst_55 [1] : vector<16x64xf32> to vector<16xf32>
    %96 = vector.shape_cast %95 : vector<16xf32> to vector<16x1xf32>
    %97 = vector.broadcast %96 : vector<16x1xf32> to vector<16x64xf32>
    %98 = arith.subf %94, %97 : vector<16x64xf32>
    %99 = math.exp %98 : vector<16x64xf32>
    %cst_56 = arith.constant dense<0.000000e+00> : vector<16xf32>
    %100 = vector.multi_reduction <add>, %99, %cst_56 [1] : vector<16x64xf32> to vector<16xf32>
    %101 = vector.shape_cast %100 : vector<16xf32> to vector<16x1xf32>
    %102 = vector.broadcast %101 : vector<16x1xf32> to vector<16x64xf32>
    %103 = arith.divf %99, %102 : vector<16x64xf32>
    %cst_57 = arith.constant dense<0.000000e+00> : vector<16x256xf32>
    %104 = tpu.matmul %103, %78, %cst_57 {dimension_numbers = #tpu.dot_dimension_numbers<[1], [0], [0], [1], [0, 0, 1, 1], [], []>} : vector<16x64xf32>, vector<64x256xf32>, vector<16x256xf32> -> vector<16x256xf32>
    %c0_58 = arith.constant 0 : index
    %c0_59 = arith.constant 0 : index
    %105 = vector.load %arg9[%c0_58, %c0_59] : memref<256x256xf32, #tpu.memory_space<vmem>>, vector<256x256xf32>
    %cst_60 = arith.constant dense<0.000000e+00> : vector<16x256xf32>
    %106 = tpu.matmul %104, %105, %cst_60 {dimension_numbers = #tpu.dot_dimension_numbers<[1], [0], [0], [1], [0, 0, 1, 1], [], []>} : vector<16x256xf32>, vector<256x256xf32>, vector<16x256xf32> -> vector<16x256xf32>
    %107 = vector.broadcast %80 : vector<1x256xf32> to vector<64x256xf32>
    %108 = arith.mulf %76, %107 : vector<64x256xf32>
    %cst_61 = arith.constant dense<0.000000e+00> : vector<64xf32>
    %109 = vector.multi_reduction <add>, %108, %cst_61 [1] : vector<64x256xf32> to vector<64xf32>
    %110 = vector.shape_cast %109 : vector<64xf32> to vector<64x1xf32>
    %cst_62 = arith.constant dense<0.000000e+00> : vector<1x16xf32>
    %111 = tpu.matmul %81, %106, %cst_62 {dimension_numbers = #tpu.dot_dimension_numbers<[1], [1], [0], [0], [0, 0, 1, 0], [], []>} : vector<1x256xf32>, vector<16x256xf32>, vector<1x16xf32> -> vector<1x16xf32>
    %112 = vector.broadcast %110 : vector<64x1xf32> to vector<64x16xf32>
    %113 = vector.broadcast %111 : vector<1x16xf32> to vector<64x16xf32>
    %114 = arith.addf %112, %113 : vector<64x16xf32>
    %cst_63 = arith.constant 0.000000e+00 : f32
    %115 = vector.broadcast %cst_63 : f32 to vector<64x16xf32>
    %116 = arith.cmpf ogt, %114, %115 : vector<64x16xf32>
    %cst_64 = arith.constant 2.000000e-01 : f32
    %117 = vector.broadcast %cst_64 : f32 to vector<64x16xf32>
    %118 = arith.mulf %117, %114 : vector<64x16xf32>
    %119 = arith.select %116, %114, %118 : vector<64x16xi1>, vector<64x16xf32>
    %cst_65 = arith.constant -9.000000e+15 : f32
    %120 = vector.broadcast %cst_65 : f32 to vector<64x16xf32>
    %121 = arith.select %5, %119, %120 : vector<64x16xi1>, vector<64x16xf32>
    %cst_66 = arith.constant dense<0xFF800000> : vector<64xf32>
    %122 = vector.multi_reduction <maximumf>, %121, %cst_66 [1] : vector<64x16xf32> to vector<64xf32>
    %123 = vector.shape_cast %122 : vector<64xf32> to vector<64x1xf32>
    %124 = vector.broadcast %123 : vector<64x1xf32> to vector<64x16xf32>
    %125 = arith.subf %121, %124 : vector<64x16xf32>
    %126 = math.exp %125 : vector<64x16xf32>
    %cst_67 = arith.constant dense<0.000000e+00> : vector<64xf32>
    %127 = vector.multi_reduction <add>, %126, %cst_67 [1] : vector<64x16xf32> to vector<64xf32>
    %128 = vector.shape_cast %127 : vector<64xf32> to vector<64x1xf32>
    %129 = vector.broadcast %128 : vector<64x1xf32> to vector<64x16xf32>
    %130 = arith.divf %126, %129 : vector<64x16xf32>
    %cst_68 = arith.constant dense<0.000000e+00> : vector<64x256xf32>
    %131 = tpu.matmul %130, %104, %cst_68 {dimension_numbers = #tpu.dot_dimension_numbers<[1], [0], [0], [1], [0, 0, 1, 1], [], []>} : vector<64x16xf32>, vector<16x256xf32>, vector<64x256xf32> -> vector<64x256xf32>
    %c0_69 = arith.constant 0 : index
    %c0_70 = arith.constant 0 : index
    %132 = vector.load %arg11[%c0_69, %c0_70] : memref<64x256xf32, #tpu.memory_space<vmem>>, vector<64x256xf32>
    tpu.vector_store %arg11[%c0_69, %c0_70], %131 {strides = array<i32>} : memref<64x256xf32, #tpu.memory_space<vmem>>, vector<64x256xf32>,
    return
  }
}

</mosaic_0001>

<bundles_post_ra>
// kernel: document_graph_forward.1
= control target key start
LH: loop header
LB: loop body
LE: loop exit
PB: predicated region body
PF: predicated region fallthrough
CT: control target
= control target key end

     0   :  { %16 = vsyncpa [#allocation3], 0  ;;  %s3975_s0 = inlined_call_operand.vmem [shape: s32[64,1], index: 0, kind: input, shape index: {}]   ;;  %s3976_s1 = inlined_call_operand.hbm [shape: f32[128,256], index: 1, kind: input, shape index: {}]   ;;  %s3977_s2 = inlined_call_operand.vmem [shape: f32[16,64], index: 2, kind: input, shape index: {}]   ;;  %s3978_s3 = inlined_call_operand.vmem [shape: f32[64,16], index: 3, kind: input, shape index: {}]   ;;  %s3979_s4 = inlined_call_operand.hbm [shape: f32[256,256], index: 4, kind: input, shape index: {}]   ;;  %s3980_s5 = inlined_call_operand.hbm [shape: f32[256,256], index: 5, kind: input, shape index: {}]   ;;  %s3981_s6 = inlined_call_operand.vmem [shape: f32[8,256], index: 6, kind: input, shape index: {}]   ;;  %s3982_s7 = inlined_call_operand.hbm [shape: f32[256,256], index: 7, kind: input, shape index: {}]   ;;  %s3983_s8 = inlined_call_operand.hbm [shape: f32[256,256], index: 8, kind: input, shape index: {}]   ;;  %s3984_s9 = inlined_call_operand.hbm [shape: f32[256,256], index: 9, kind: input, shape index: {}]   ;;  %s3985_s10 = inlined_call_operand.vmem [shape: f32[8,256], index: 10, kind: input, shape index: {}]   ;;  %s3986_s11 = inlined_call_operand.vmem [shape: f32[64,256], index: 11, kind: output, shape index: {}]  }
   0x1   :  { %17 = vsyncpa [#allocation5], 0 }
   0x2   :  { %18 = vsyncpa [#allocation8], 0 }
   0x3   :  { %19 = vsyncpa [#allocation11], 0  ;;  %s3231_s17 = smov [#allocation4]   ;;  %s3232_s19 = smov [#allocation7]  }
   0x4   :  { %s43_s18 = sshll.u32 %s3231_s17, 4  ;;  %s69_s20 = sshll.u32 %s3232_s19, 4  ;;  %s44_s18 = int_to_ptr.vmem [resolvable:$true] %s43_s18  ;;  %s3302_s20 = int_to_ptr.vmem [resolvable:$true] %s69_s20 }
   0x5   :  { %s3091_s23 = scalar_lea.hbm %s3979_s4, 8192 }
   0x6   :  { %p3092_p0 = scmp.ne.s32.totalorder %s3979_s4, %s3091_s23  ;;  %p3095_p1 = scmp.lt.u32.totalorder %s3091_s23, %s3979_s4 }
   0x8   :  { %p3097_p2 = pnand %p3095_p1, %p3092_p0 }
   0xa   :  { %3100 = shalt.err (!%p3097_p2)
}
   0xb   :  { %s3101_s28 = scalar_lea.vmem %s44_s18, 8192  ;;  %p3106_p4 = scmp.lt.s32.totalorder %s44_s18, %s44_s18 }
   0xc   :  { %p3102_p3 = scmp.ne.s32.totalorder %s44_s18, %s3101_s28  ;;  %p3107_p5 = scmp.lt.s32.totalorder %s3101_s28, %s3101_s28 }
   0xe   :  { %p3108_p6 = por %p3107_p5, %p3106_p4 }
  0x10   :  { %p3109_p7 = pnand %p3108_p6, %p3102_p3 }
  0x12   :  { %3112 = shalt.err (!%p3109_p7)
}
  0x13   :  { %s3233_s29 = smov 256   ;;  %s3234_s30 = smov 16  }
  0x14   :  { %49 = dma.hbm_to_vmem [thread:$0]  %s3979_s4, 8192, %s44_s18, [#allocation5], %s3233_s29, %s3233_s29, %s3234_s30  }
  0x15   :  { %s3113_s16 = scalar_lea.hbm %s3982_s7, 8192 }
  0x16   :  { %p3114_p8 = scmp.ne.s32.totalorder %s3982_s7, %s3113_s16  ;;  %p3117_p9 = scmp.lt.u32.totalorder %s3113_s16, %s3982_s7 }
  0x18   :  { %p3119_p10 = pnand %p3117_p9, %p3114_p8 }
  0x1a   :  { %3122 = shalt.err (!%p3119_p10)
}
  0x1b   :  { %s3123_s23 = scalar_lea.vmem %s3302_s20, 8192  ;;  %p3128_p12 = scmp.lt.s32.totalorder %s3302_s20, %s3302_s20 }
  0x1c   :  { %p3124_p11 = scmp.ne.s32.totalorder %s3302_s20, %s3123_s23  ;;  %p3129_p13 = scmp.lt.s32.totalorder %s3123_s23, %s3123_s23 }
  0x1e   :  { %p3130_p0 = por %p3129_p13, %p3128_p12 }
  0x20   :  { %p3131_p1 = pnand %p3130_p0, %p3124_p11 }
  0x22   :  { %3134 = shalt.err (!%p3131_p1)
}
  0x23   :  { %75 = dma.hbm_to_vmem [thread:$0]  %s3982_s7, 8192, %s3302_s20, [#allocation8], %s3233_s29, %s3233_s29, %s3234_s30  }
  0x24   :  { %s3235_s24 = smov [#allocation2]   ;;  %s3236_s26 = smov [#allocation6]  }
  0x25   :  { %s27_s25 = sshll.u32 %s3235_s24, 4  ;;  %s55_s27 = sshll.u32 %s3236_s26, 4  ;;  %s28_s25 = int_to_ptr.vmem [resolvable:$true] %s27_s25  ;;  %s3339_s27 = int_to_ptr.vmem [resolvable:$true] %s55_s27 }
  0x26   :  { %s3135_s13 = scalar_lea.hbm %s3976_s1, 4096 }
  0x27   :  { %p3136_p2 = scmp.ne.s32.totalorder %s3976_s1, %s3135_s13  ;;  %p3139_p3 = scmp.lt.u32.totalorder %s3135_s13, %s3976_s1 }
  0x29   :  { %p3141_p4 = pnand %p3139_p3, %p3136_p2 }
  0x2b   :  { %3144 = shalt.err (!%p3141_p4)
}
  0x2c   :  { %s3145_s7 = scalar_lea.vmem %s28_s25, 4096  ;;  %p3150_p6 = scmp.lt.s32.totalorder %s28_s25, %s28_s25 }
  0x2d   :  { %p3146_p5 = scmp.ne.s32.totalorder %s28_s25, %s3145_s7  ;;  %p3151_p7 = scmp.lt.s32.totalorder %s3145_s7, %s3145_s7 }
  0x2f   :  { %p3152_p8 = por %p3151_p7, %p3150_p6 }
  0x31   :  { %p3153_p9 = pnand %p3152_p8, %p3146_p5 }
  0x33   :  { %3156 = shalt.err (!%p3153_p9)
}
  0x34   :  { %33 = dma.hbm_to_vmem [thread:$0]  %s3976_s1, 4096, %s28_s25, [#allocation3], %s3233_s29, %s3233_s29, %s3234_s30  }
  0x35   :  { %s3157_s23 = scalar_lea.hbm %s3980_s5, 8192 }
  0x36   :  { %p3158_p10 = scmp.ne.s32.totalorder %s3980_s5, %s3157_s23  ;;  %p3161_p11 = scmp.lt.u32.totalorder %s3157_s23, %s3980_s5 }
  0x38   :  { %p3163_p12 = pnand %p3161_p11, %p3158_p10 }
  0x3a   :  { %3166 = shalt.err (!%p3163_p12)
}
  0x3b   :  { %s3167_s28 = scalar_lea.vmem %s3339_s27, 8192  ;;  %p3172_p0 = scmp.lt.s32.totalorder %s3339_s27, %s3339_s27 }
  0x3c   :  { %p3168_p13 = scmp.ne.s32.totalorder %s3339_s27, %s3167_s28  ;;  %p3173_p1 = scmp.lt.s32.totalorder %s3167_s28, %s3167_s28 }
  0x3e   :  { %p3174_p2 = por %p3173_p1, %p3172_p0 }
  0x40   :  { %p3175_p3 = pnand %p3174_p2, %p3168_p13 }
  0x42   :  { %3178 = shalt.err (!%p3175_p3)
}
  0x43   :  { %61 = dma.hbm_to_vmem [thread:$0]  %s3980_s5, 8192, %s3339_s27, [#allocation5], %s3233_s29, %s3233_s29, %s3234_s30  }
  0x44   :  { %s3237_s12 = smov [#allocation9]   ;;  %s3238_s14 = smov [#allocation10]  }
  0x45   :  { %s81_s13 = sshll.u32 %s3237_s12, 4  ;;  %s93_s15 = sshll.u32 %s3238_s14, 4  ;;  %s82_s13 = int_to_ptr.vmem [resolvable:$true] %s81_s13  ;;  %s3376_s15 = int_to_ptr.vmem [resolvable:$true] %s93_s15 }
  0x46   :  { %s3179_s7 = scalar_lea.hbm %s3983_s8, 8192 }
  0x47   :  { %p3180_p4 = scmp.ne.s32.totalorder %s3983_s8, %s3179_s7  ;;  %p3183_p5 = scmp.lt.u32.totalorder %s3179_s7, %s3983_s8 }
  0x49   :  { %p3185_p6 = pnand %p3183_p5, %p3180_p4 }
  0x4b   :  { %3188 = shalt.err (!%p3185_p6)
}
  0x4c   :  { %s3189_s5 = scalar_lea.vmem %s82_s13, 8192  ;;  %p3194_p8 = scmp.lt.s32.totalorder %s82_s13, %s82_s13 }
  0x4d   :  { %p3190_p7 = scmp.ne.s32.totalorder %s82_s13, %s3189_s5  ;;  %p3195_p9 = scmp.lt.s32.totalorder %s3189_s5, %s3189_s5 }
  0x4f   :  { %p3196_p10 = por %p3195_p9, %p3194_p8 }
  0x51   :  { %p3197_p11 = pnand %p3196_p10, %p3190_p7 }
  0x53   :  { %3200 = shalt.err (!%p3197_p11)
}
  0x54   :  { %87 = dma.hbm_to_vmem [thread:$0]  %s3983_s8, 8192, %s82_s13, [#allocation8], %s3233_s29, %s3233_s29, %s3234_s30  }
  0x55   :  { %s3201_s24 = scalar_lea.hbm %s3984_s9, 8192 }
  0x56   :  { %p3202_p12 = scmp.ne.s32.totalorder %s3984_s9, %s3201_s24  ;;  %p3205_p13 = scmp.lt.u32.totalorder %s3201_s24, %s3984_s9 }
  0x58   :  { %p3207_p0 = pnand %p3205_p13, %p3202_p12 }
  0x5a   :  { %3210 = shalt.err (!%p3207_p0)
}
  0x5b   :  { %s3211_s12 = scalar_lea.vmem %s3376_s15, 8192  ;;  %p3216_p2 = scmp.lt.s32.totalorder %s3376_s15, %s3376_s15 }
  0x5c   :  { %p3212_p1 = scmp.ne.s32.totalorder %s3376_s15, %s3211_s12  ;;  %p3217_p3 = scmp.lt.s32.totalorder %s3211_s12, %s3211_s12 }
  0x5e   :  { %p3218_p4 = por %p3217_p3, %p3216_p2 }
  0x60   :  { %p3219_p5 = pnand %p3218_p4, %p3212_p1 }
  0x62   :  { %3222 = shalt.err (!%p3219_p5)
}
  0x63   :  { %99 = dma.hbm_to_vmem [thread:$0]  %s3984_s9, 8192, %s3376_s15, [#allocation11], %s3233_s29, %s3233_s29, %s3234_s30  }
  0x64   :  { %3223 = dma.done.wait [#allocation3], 4096  }
  0x65   :  { %3224 = vsyncadd [#allocation3], 4294963200 }
  0x66   :  { %3225 = dma.done.wait [#allocation5], 16384  }
  0x67   :  { %3226 = vsyncadd [#allocation5], 4294950912 }
  0x68   :  { %3227 = dma.done.wait [#allocation8], 16384  }
  0x69   :  { %3228 = vsyncadd [#allocation8], 4294950912 }
  0x6a   :  { %3229 = dma.done.wait [#allocation11], 8192  }
  0x6b   :  { %3230 = vsyncadd [#allocation11], 4294959104  ;;  %v3239_v0 = vmov 0   ;;  %v142_v1 = vld [vmem:[%s3975_s0 + $0x10] sm:$0xff]  ;;  %v140_v2 = vld [vmem:[%s3975_s0] sm:$0xff]  ;;  %v3240_v5 = vmov 0.0  }
  0x6c   :  { %2978 = vset.pattern.permute.xlu1 %v3239_v0  ;;  %2977 = vset.pattern.permute.xlu0 %v3239_v0  ;;  %v143_v3 = vld [vmem:[%s3975_s0 + $0x18] sm:$0xff]  ;;  %v141_v4 = vld [vmem:[%s3975_s0 + $0x8] sm:$0xff]  ;;  %v198_v8 = vld [vmem:[#allocation2] sm:$0xff]  ;;  %vm622_vm11 = vcmask 523264   ;;  %vm1045_vm13 = vcmask 130048  }
  0x6d   :  { %157 = vperm.xlu1 %2978, %v142_v1   ;;  %151 = vperm.xlu0 %2977, %v140_v2   ;;  %v199_v6 = vld [vmem:[#allocation2 + $0x8] sm:$0xff]  ;;  %v201_v7 = vld [vmem:[#allocation2 + $0x18] sm:$0xff]  ;;  %v200_v10 = vld [vmem:[#allocation2 + $0x10] sm:$0xff] }
  0x6e   :  { %294 = vmatprep.mubr.f32.mxu0 %v3240_v5  ;;  %v2534_v9 = vpack.c.bf16 %v201_v7, %v199_v6  ;;  %v203_v11 = vld [vmem:[#allocation2 + $0x28] sm:$0xff]  ;;  %v205_v12 = vld [vmem:[#allocation2 + $0x38] sm:$0xff]  ;;  %v2536_v13 = vpack.c.bf16 %v200_v10, %v198_v8  ;;  %v202_v15 = vld [vmem:[#allocation2 + $0x20] sm:$0xff] }
  0x6f   :  { %v2538_v14 = vpack.c.bf16 %v205_v12, %v203_v11  ;;  %v204_v16 = vld [vmem:[#allocation2 + $0x30] sm:$0xff]  ;;  %v207_v17 = vld [vmem:[#allocation2 + $0x48] sm:$0xff]  ;;  %v144_v19 = vld [vmem:[%s3975_s0 + $0x20] sm:$0xff] }
  0x70   :  { %v145_v18 = vld [vmem:[%s3975_s0 + $0x28] sm:$0xff]  ;;  %2535 = vmatprep.subr.bf16.mxu0 %v2534_v9  ;;  %v209_v20 = vld [vmem:[#allocation2 + $0x58] sm:$0xff]  ;;  %v2540_v21 = vpack.c.bf16 %v204_v16, %v202_v15  ;;  %v206_v23 = vld [vmem:[#allocation2 + $0x40] sm:$0xff] }
  0x71   :  { %160 = vperm.xlu1 %2978, %v143_v3   ;;  %154 = vperm.xlu0 %2977, %v141_v4   ;;  %v2542_v22 = vpack.c.bf16 %v209_v20, %v207_v17  ;;  %v208_v24 = vld [vmem:[#allocation2 + $0x50] sm:$0xff]  ;;  %v211_v25 = vld [vmem:[#allocation2 + $0x68] sm:$0xff]  ;;  %v213_v26 = vld [vmem:[#allocation2 + $0x78] sm:$0xff] }
  0x72   :  { %2537 = vmatpush1.bf16.msra.mxu0 %v2536_v13  ;;  %v147_v27 = vld [vmem:[%s3975_s0 + $0x38] sm:$0xff]  ;;  %v146_v28 = vld [vmem:[%s3975_s0 + $0x30] sm:$0xff]  ;;  %v2544_v29 = vpack.c.bf16 %v208_v24, %v206_v23  ;;  %v2546_v30 = vpack.c.bf16 %v213_v26, %v211_v25  ;;  %v210_v31 = vld [vmem:[#allocation2 + $0x60] sm:$0xff] }
  0x73   :  { %2539 = vmatprep.subr.bf16.mxu0 %v2538_v14  ;;  %v212_v32 = vld [vmem:[#allocation2 + $0x70] sm:$0xff]  ;;  %v215_v33 = vld [vmem:[#allocation2 + $0x88] sm:$0xff]  ;;  %v217_v34 = vld [vmem:[#allocation2 + $0x98] sm:$0xff] }
  0x74   :  { %v525_v35 = vld [vmem:[%s3981_s6 + $0x3] ss:$0 sm:$0xff]  ;;  %v2548_v36 = vpack.c.bf16 %v212_v32, %v210_v31  ;;  %v2550_v37 = vpack.c.bf16 %v217_v34, %v215_v33  ;;  %v216_v39 = vld [vmem:[#allocation2 + $0x90] sm:$0xff]  ;;  %v219_v40 = vld [vmem:[#allocation2 + $0xa8] sm:$0xff] }
  0x75   :  { %166 = vperm.xlu1 %2978, %v145_v18   ;;  %163 = vperm.xlu0 %2977, %v144_v19   ;;  %v214_v38 = vld [vmem:[#allocation2 + $0x80] sm:$0xff]  ;;  %v221_v41 = vld [vmem:[#allocation2 + $0xb8] sm:$0xff]  ;;  %v220_v45 = vld [vmem:[#allocation2 + $0xb0] sm:$0xff] }
  0x76   :  { %2541 = vmatpush1.bf16.msra.mxu0 %v2540_v21  ;;  %v2552_v42 = vpack.c.bf16 %v216_v39, %v214_v38  ;;  %v2554_v43 = vpack.c.bf16 %v221_v41, %v219_v40  ;;  %v218_v44 = vld [vmem:[#allocation2 + $0xa0] sm:$0xff]  ;;  %v223_v46 = vld [vmem:[#allocation2 + $0xc8] sm:$0xff]  ;;  %v225_v47 = vld [vmem:[#allocation2 + $0xd8] sm:$0xff] }
  0x77   :  { %2543 = vmatprep.subr.bf16.mxu0 %v2542_v22  ;;  %v2556_v48 = vpack.c.bf16 %v220_v45, %v218_v44  ;;  %v2558_v49 = vpack.c.bf16 %v225_v47, %v223_v46  ;;  %v222_v50 = vld [vmem:[#allocation2 + $0xc0] sm:$0xff]  ;;  %v224_v51 = vld [vmem:[#allocation2 + $0xd0] sm:$0xff]  ;;  %v227_v52 = vld [vmem:[#allocation2 + $0xe8] sm:$0xff] }
  0x78   :  { %v229_v53 = vld [vmem:[#allocation2 + $0xf8] sm:$0xff]  ;;  %v2560_v54 = vpack.c.bf16 %v224_v51, %v222_v50  ;;  %v226_v56 = vld [vmem:[#allocation2 + $0xe0] sm:$0xff]  ;;  %v228_v57 = vld [vmem:[#allocation2 + $0xf0] sm:$0xff] }
  0x79   :  { %172 = vperm.xlu1 %2978, %v147_v27   ;;  %169 = vperm.xlu0 %2977, %v146_v28   ;;  %v2562_v55 = vpack.c.bf16 %v229_v53, %v227_v52  ;;  %v344_v58 = vld [vmem:[#allocation4 + $0x8] sm:$0xff]  ;;  %v346_v59 = vld [vmem:[#allocation4 + $0x18] sm:$0xff]  ;;  %v343_v60 = vld [vmem:[#allocation4] sm:$0xff]  ;;  %v2564_v61 = vpack.c.bf16 %v228_v57, %v226_v56 }
  0x7a   :  { %2545 = vmatpush1.bf16.msra.mxu0 %v2544_v29  ;;  %v2566_v62 = vpack.c.bf16 %v346_v59, %v344_v58  ;;  %v345_v63 = vld [vmem:[#allocation4 + $0x10] sm:$0xff]  ;;  %v348_v0 = vld [vmem:[#allocation4 + $0x28] sm:$0xff]  ;;  %v350_v1 = vld [vmem:[#allocation4 + $0x38] sm:$0xff] }
  0x7b   :  { %2547 = vmatprep.subr.bf16.mxu0 %v2546_v30  ;;  %v2568_v2 = vpack.c.bf16 %v345_v63, %v343_v60  ;;  %v2570_v3 = vpack.c.bf16 %v350_v1, %v348_v0  ;;  %v347_v4 = vld [vmem:[#allocation4 + $0x20] sm:$0xff]  ;;  %v349_v6 = vld [vmem:[#allocation4 + $0x30] sm:$0xff]  ;;  %v352_v7 = vld [vmem:[#allocation4 + $0x48] sm:$0xff] }
  0x7c   :  { %2567 = vmatprep.subr.bf16.mxu1 %v2566_v62  ;;  %v354_v8 = vld [vmem:[#allocation4 + $0x58] sm:$0xff]  ;;  %v2572_v9 = vpack.c.bf16 %v349_v6, %v347_v4  ;;  %v351_v11 = vld [vmem:[#allocation4 + $0x40] sm:$0xff]  ;;  %v353_v12 = vld [vmem:[#allocation4 + $0x50] sm:$0xff] }
  0x7d   :  { %609 = vperm.xlu0 %2977, %v525_v35   ;;  %2569 = vmatpush1.bf16.msra.mxu1 %v2568_v2  ;;  %v2574_v10 = vpack.c.bf16 %v354_v8, %v352_v7  ;;  %v356_v13 = vld [vmem:[#allocation4 + $0x68] sm:$0xff]  ;;  %v358_v14 = vld [vmem:[#allocation4 + $0x78] sm:$0xff]  ;;  %v2576_v15 = vpack.c.bf16 %v353_v12, %v351_v11  ;;  %v355_v17 = vld [vmem:[#allocation4 + $0x60] sm:$0xff] }
  0x7e   :  { %2549 = vmatpush1.bf16.msra.mxu0 %v2548_v36  ;;  %2571 = vmatprep.subr.bf16.mxu1 %v2570_v3  ;;  %v2578_v16 = vpack.c.bf16 %v358_v14, %v356_v13  ;;  %v357_v18 = vld [vmem:[#allocation4 + $0x70] sm:$0xff]  ;;  %v360_v19 = vld [vmem:[#allocation4 + $0x88] sm:$0xff]  ;;  %v362_v20 = vld [vmem:[#allocation4 + $0x98] sm:$0xff] }
  0x7f   :  { %2551 = vmatprep.subr.bf16.mxu0 %v2550_v37  ;;  %v2580_v21 = vpack.c.bf16 %v357_v18, %v355_v17  ;;  %v2582_v22 = vpack.c.bf16 %v362_v20, %v360_v19  ;;  %v359_v23 = vld [vmem:[#allocation4 + $0x80] sm:$0xff]  ;;  %v361_v24 = vld [vmem:[#allocation4 + $0x90] sm:$0xff]  ;;  %v364_v25 = vld [vmem:[#allocation4 + $0xa8] sm:$0xff] }
  0x80   :  { %v366_v26 = vld [vmem:[#allocation4 + $0xb8] sm:$0xff]  ;;  %v2584_v27 = vpack.c.bf16 %v361_v24, %v359_v23  ;;  %v363_v29 = vld [vmem:[#allocation4 + $0xa0] sm:$0xff]  ;;  %v365_v30 = vld [vmem:[#allocation4 + $0xb0] sm:$0xff] }
  0x81   :  { %2573 = vmatpush1.bf16.msra.mxu1 %v2572_v9  ;;  %v2586_v28 = vpack.c.bf16 %v366_v26, %v364_v25  ;;  %v368_v31 = vld [vmem:[#allocation4 + $0xc8] sm:$0xff]  ;;  %v370_v32 = vld [vmem:[#allocation4 + $0xd8] sm:$0xff]  ;;  %v2588_v33 = vpack.c.bf16 %v365_v30, %v363_v29  ;;  %v367_v35 = vld [vmem:[#allocation4 + $0xc0] sm:$0xff]  ;;  %v148_v26 = vlaneseq  ;;  %v3241_v29 = vmov 1.0  }
  0x82   :  { %2553 = vmatpush1.bf16.msra.mxu0 %v2552_v42  ;;  %2575 = vmatprep.subr.bf16.mxu1 %v2574_v10  ;;  %v2590_v34 = vpack.c.bf16 %v370_v32, %v368_v31  ;;  %v369_v36 = vld [vmem:[#allocation4 + $0xd0] sm:$0xff]  ;;  %v372_v37 = vld [vmem:[#allocation4 + $0xe8] sm:$0xff]  ;;  %v374_v38 = vld [vmem:[#allocation4 + $0xf8] sm:$0xff] }
  0x83   :  { %2555 = vmatprep.subr.bf16.mxu0 %v2554_v43  ;;  %v2592_v39 = vpack.c.bf16 %v369_v36, %v367_v35  ;;  %v2594_v40 = vpack.c.bf16 %v374_v38, %v372_v37  ;;  %v371_v41 = vld [vmem:[#allocation4 + $0xe0] sm:$0xff]  ;;  %v373_v42 = vld [vmem:[#allocation4 + $0xf0] sm:$0xff]  ;;  %v376_v43 = vld [vmem:[#allocation4 + $0x108] sm:$0xff] }
  0x84   :  { %v378_v44 = vld [vmem:[#allocation4 + $0x118] sm:$0xff]  ;;  %v2596_v45 = vpack.c.bf16 %v373_v42, %v371_v41  ;;  %v375_v47 = vld [vmem:[#allocation4 + $0x100] sm:$0xff]  ;;  %v385_v60 = vld [vmem:[#allocation4 + $0x150] sm:$0xff] }
  0x85   :  { %2577 = vmatpush1.bf16.msra.mxu1 %v2576_v15  ;;  %v2598_v46 = vpack.c.bf16 %v378_v44, %v376_v43  ;;  %v382_v50 = vld [vmem:[#allocation4 + $0x138] sm:$0xff]  ;;  %v379_v53 = vld [vmem:[#allocation4 + $0x120] sm:$0xff]  ;;  %v389_v2 = vld [vmem:[#allocation4 + $0x170] sm:$0xff] }
  0x86   :  { %2557 = vmatpush1.bf16.msra.mxu0 %v2556_v48  ;;  %2579 = vmatprep.subr.bf16.mxu1 %v2578_v16  ;;  %v377_v48 = vld [vmem:[#allocation4 + $0x110] sm:$0xff]  ;;  %v386_v56 = vld [vmem:[#allocation4 + $0x158] sm:$0xff]  ;;  %v383_v59 = vld [vmem:[#allocation4 + $0x140] sm:$0xff] }
  0x87   :  { %2559 = vmatprep.subr.bf16.mxu0 %v2558_v49  ;;  %v380_v49 = vld [vmem:[#allocation4 + $0x128] sm:$0xff]  ;;  %v2600_v51 = vpack.c.bf16 %v377_v48, %v375_v47  ;;  %v390_v62 = vld [vmem:[#allocation4 + $0x178] sm:$0xff]  ;;  %v2608_v63 = vpack.c.bf16 %v385_v60, %v383_v59  ;;  %v387_v1 = vld [vmem:[#allocation4 + $0x160] sm:$0xff] }
  0x88   :  { %v2602_v52 = vpack.c.bf16 %v382_v50, %v380_v49  ;;  %v392_v3 = vld [vmem:[#allocation4 + $0x188] sm:$0xff]  ;;  %v394_v4 = vld [vmem:[#allocation4 + $0x198] sm:$0xff]  ;;  %v2612_v6 = vpack.c.bf16 %v389_v2, %v387_v1  ;;  %v391_v8 = vld [vmem:[#allocation4 + $0x180] sm:$0xff] }
  0x89   :  { %2581 = vmatpush1.bf16.msra.mxu1 %v2580_v21  ;;  %v2614_v7 = vpack.c.bf16 %v394_v4, %v392_v3  ;;  %v393_v9 = vld [vmem:[#allocation4 + $0x190] sm:$0xff]  ;;  %v396_v10 = vld [vmem:[#allocation4 + $0x1a8] sm:$0xff]  ;;  %v398_v11 = vld [vmem:[#allocation4 + $0x1b8] sm:$0xff] }
  0x8a   :  { %2561 = vmatpush1.bf16.msra.mxu0 %v2560_v54  ;;  %2583 = vmatprep.subr.bf16.mxu1 %v2582_v22  ;;  %v381_v54 = vld [vmem:[#allocation4 + $0x130] sm:$0xff]  ;;  %v2616_v12 = vpack.c.bf16 %v393_v9, %v391_v8  ;;  %v2618_v13 = vpack.c.bf16 %v398_v11, %v396_v10  ;;  %v395_v14 = vld [vmem:[#allocation4 + $0x1a0] sm:$0xff]  ;;  %v400_v16 = vld [vmem:[#allocation4 + $0x1c8] sm:$0xff] }
  0x8b   :  { %2563 = vmatprep.subr.bf16.mxu0 %v2562_v55  ;;  %v384_v55 = vld [vmem:[#allocation4 + $0x148] sm:$0xff]  ;;  %v2604_v57 = vpack.c.bf16 %v381_v54, %v379_v53  ;;  %v397_v15 = vld [vmem:[#allocation4 + $0x1b0] sm:$0xff]  ;;  %v402_v17 = vld [vmem:[#allocation4 + $0x1d8] sm:$0xff] }
  0x8c   :  { %v2606_v58 = vpack.c.bf16 %v386_v56, %v384_v55  ;;  %v2620_v18 = vpack.c.bf16 %v397_v15, %v395_v14  ;;  %v2622_v19 = vpack.c.bf16 %v402_v17, %v400_v16  ;;  %v399_v20 = vld [vmem:[#allocation4 + $0x1c0] sm:$0xff]  ;;  %v401_v21 = vld [vmem:[#allocation4 + $0x1d0] sm:$0xff]  ;;  %v404_v22 = vld [vmem:[#allocation4 + $0x1e8] sm:$0xff] }
  0x8d   :  { %2585 = vmatpush1.bf16.msra.mxu1 %v2584_v27  ;;  %v406_v23 = vld [vmem:[#allocation4 + $0x1f8] sm:$0xff]  ;;  %v2624_v24 = vpack.c.bf16 %v401_v21, %v399_v20  ;;  %v149_v27 = vand.u32 127, %v148_v26  ;;  %v403_v37 = vld [vmem:[#allocation4 + $0x1e0] sm:$0xff]  ;;  %v405_v38 = vld [vmem:[#allocation4 + $0x1f0] sm:$0xff] }
  0x8e   :  { %2565 = vmatpush1.bf16.msra.mxu0 %v2564_v61  ;;  %2587 = vmatprep.subr.bf16.mxu1 %v2586_v28  ;;  %v388_v61 = vld [vmem:[#allocation4 + $0x168] sm:$0xff]  ;;  %v2626_v25 = vpack.c.bf16 %v406_v23, %v404_v22 }
  0x8f   :  { %v2610_v0 = vpack.c.bf16 %v390_v62, %v388_v61  ;;  %v3519_v2 = vld [vmem:[%s3981_s6] ss:$8 sm:$0x3] }
  0x91   :  { %2589 = vmatpush1.bf16.msra.mxu1 %v2588_v33 }
  0x92   :  { %2591 = vmatprep.subr.bf16.mxu1 %v2590_v34 }
  0x95   :  { %2593 = vmatpush1.bf16.msra.mxu1 %v2592_v39  ;;  %v2628_v39 = vpack.c.bf16 %v405_v38, %v403_v37 }
  0x96   :  { %2595 = vmatprep.subr.bf16.mxu1 %v2594_v40 }
  0x99   :  { %2597 = vmatpush1.bf16.msra.mxu1 %v2596_v45 }
  0x9a   :  { %2599 = vmatprep.subr.bf16.mxu1 %v2598_v46 }
  0x9d   :  { %2601 = vmatpush1.bf16.msra.mxu1 %v2600_v51 }
  0x9e   :  { %2603 = vmatprep.subr.bf16.mxu1 %v2602_v52 }
  0xa1   :  { %2605 = vmatpush1.bf16.msra.mxu1 %v2604_v57 }
  0xa2   :  { %2607 = vmatprep.subr.bf16.mxu1 %v2606_v58 }
  0xa5   :  { %2609 = vmatpush1.bf16.msra.mxu1 %v2608_v63 }
  0xa6   :  { %2611 = vmatprep.subr.bf16.mxu1 %v2610_v0  ;;  %v528_v0 = vshrl.u32 %v148_v26, 7 }
  0xa8   :  { %v3514_v1 = vsub.s32 1, %v528_v0  ;;  %v3523_v4 = vsub.s32 0, %v528_v0 }
  0xa9   :  { %2613 = vmatpush1.bf16.msra.mxu1 %v2612_v6  ;;  %v2494_v6 = vld [vmem:[%s3981_s6 + $0x1] ss:$8 sm:$0x3] }
  0xaa   :  { %2615 = vmatprep.subr.bf16.mxu1 %v2614_v7  ;;  %v534_v3 = vrot.slane %v3519_v2, %v3514_v1  ;;  %v873_v7 = vrot.slane %v2494_v6, %v3523_v4  ;;  %v877_v8 = vrot.slane %v2494_v6, %v3514_v1 }
  0xad   :  { %2617 = vmatpush1.bf16.msra.mxu1 %v2616_v12 }
  0xae   :  { %2619 = vmatprep.subr.bf16.mxu1 %v2618_v13 }
  0xb1   :  { %2621 = vmatpush1.bf16.msra.mxu1 %v2620_v18 }
  0xb2   :  { %2623 = vmatprep.subr.bf16.mxu1 %v2622_v19 }
  0xb5   :  { %2625 = vmatpush1.bf16.msra.mxu1 %v2624_v24 }
  0xb6   :  { %2627 = vmatprep.subr.bf16.mxu1 %v2626_v25 }
  0xb9   :  { %2629 = vmatpush1.bf16.msra.mxu1 %v2628_v39 }
  0xec   :  { %v152_v28 = vpop.permute.xlu0 %151  ;;  %v158_v31 = vpop.permute.xlu1 %157 }
  0xed   :  { %vm174_vm0 = vcmp.eq.s32.totalorder %v152_v28, %v149_v27  ;;  %vm176_vm2 = vcmp.eq.s32.totalorder %v158_v31, %v149_v27 }
  0xee   :  { %2486 = vmatmul.mubr.msk.f32.vlgmr.msra.gmra.mrb[0].mxu0 %vm174_vm0, %v3241_v29 }
  0xef   :  { %300 = vmatprep.mubr.f32.mxu0 %v3240_v5 }
  0xf0   :  { %v155_v30 = vpop.permute.xlu0 %154  ;;  %v161_v32 = vpop.permute.xlu1 %160 }
  0xf1   :  { %vm175_vm1 = vcmp.eq.s32.totalorder %v155_v30, %v149_v27  ;;  %vm177_vm3 = vcmp.eq.s32.totalorder %v161_v32, %v149_v27 }
  0xf2   :  { %2487 = vmatmul.mubr.msk.f32.gmra.mrb[2].mxu0 %vm175_vm1, %v3241_v29 }
  0xf3   :  { %306 = vmatprep.mubr.f32.mxu0 %v3240_v5 }
  0xf4   :  { %v164_v33 = vpop.permute.xlu0 %163  ;;  %v167_v34 = vpop.permute.xlu1 %166 }
  0xf5   :  { %vm178_vm4 = vcmp.eq.s32.totalorder %v164_v33, %v149_v27  ;;  %vm179_vm5 = vcmp.eq.s32.totalorder %v167_v34, %v149_v27 }
  0xf6   :  { %2488 = vmatmul.mubr.msk.f32.gmra.mrb[4].mxu0 %vm176_vm2, %v3241_v29 }
  0xf7   :  { %312 = vmatprep.mubr.f32.mxu0 %v3240_v5 }
  0xf8   :  { %v170_v35 = vpop.permute.xlu0 %169  ;;  %v173_v36 = vpop.permute.xlu1 %172 }
  0xf9   :  { %vm180_vm6 = vcmp.eq.s32.totalorder %v170_v35, %v149_v27  ;;  %vm181_vm7 = vcmp.eq.s32.totalorder %v173_v36, %v149_v27 }
  0xfa   :  { %2489 = vmatmul.mubr.msk.f32.gmra.mrb[6].mxu0 %vm177_vm3, %v3241_v29 }
  0xfb   :  { %318 = vmatprep.mubr.f32.mxu0 %v3240_v5 }
  0xfe   :  { %2490 = vmatmul.mubr.msk.f32.gmra.mrb[8].mxu0 %vm178_vm4, %v3241_v29 }
  0xff   :  { %324 = vmatprep.mubr.f32.mxu0 %v3240_v5 }
 0x102   :  { %2491 = vmatmul.mubr.msk.f32.gmra.mrb[10].mxu0 %vm179_vm5, %v3241_v29 }
 0x103   :  { %330 = vmatprep.mubr.f32.mxu0 %v3240_v5 }
 0x106   :  { %2492 = vmatmul.mubr.msk.f32.gmra.mrb[12].mxu0 %vm180_vm6, %v3241_v29 }
 0x107   :  { %336 = vmatprep.mubr.f32.mxu0 %v3240_v5 }
 0x10a   :  { %2493 = vmatmul.mubr.msk.f32.gmra.mrb[14].mxu0 %vm181_vm7, %v3241_v29 }
 0x10b   :  { %601 = vmatprep.mubr.f32.mxu0 %v534_v3 }
 0x1c1   :  { %v3449_v40 = vpop.f32.mrb[0].mxu0 }
 0x1c2   :  { %v3451_v41 = vpop.f32.mrb[1].mxu0 }
 0x1c3   :  { %471 = vmatprep.mubr.f32.mxu1 %v3451_v41 }
 0x1c4   :  { %472 = vmatmul.mubr.f32.vlgmr.msra.gmra.mrb[0].mxu1 %v3449_v40 }
 0x1c5   :  { %v3455_v42 = vpop.f32.mrb[2].mxu0 }
 0x1c6   :  { %v2648_v43 = vpack.c.bf16 %v3455_v42, %v3449_v40  ;;  %v3459_v44 = vpop.f32.mrb[3].mxu0  ;;  %v610_v40 = vpop.permute.xlu0 %609 }
 0x1c7   :  { %v2646_v45 = vpack.c.bf16 %v3459_v44, %v3451_v41  ;;  %477 = vmatprep.mubr.f32.mxu1 %v3459_v44  ;;  %v3570_v44 = vld [vmem:[%s3977_s2 + $0x8] sm:$0xff] }
 0x1c8   :  { %478 = vmatmul.mubr.f32.gmra.mrb[2].mxu1 %v3455_v42  ;;  %vm123_vm9 = vcmp.gt.f32.partialorder %v3570_v44, 0.0 }
 0x1c9   :  { %v3465_v46 = vpop.f32.mrb[4].mxu0 }
 0x1ca   :  { %v3467_v47 = vpop.f32.mrb[5].mxu0 }
 0x1cb   :  { %483 = vmatprep.mubr.f32.mxu1 %v3467_v47 }
 0x1cc   :  { %484 = vmatmul.mubr.f32.gmra.mrb[4].mxu1 %v3465_v46 }
 0x1cd   :  { %v3471_v48 = vpop.f32.mrb[6].mxu0 }
 0x1ce   :  { %v2652_v49 = vpack.c.bf16 %v3471_v48, %v3465_v46  ;;  %v3475_v50 = vpop.f32.mrb[7].mxu0 }
 0x1cf   :  { %v2650_v51 = vpack.c.bf16 %v3475_v50, %v3467_v47  ;;  %489 = vmatprep.mubr.f32.mxu1 %v3475_v50 }
 0x1d0   :  { %490 = vmatmul.mubr.f32.gmra.mrb[6].mxu1 %v3471_v48 }
 0x1d1   :  { %v3481_v52 = vpop.f32.mrb[8].mxu0 }
 0x1d2   :  { %v3483_v53 = vpop.f32.mrb[9].mxu0 }
 0x1d3   :  { %495 = vmatprep.mubr.f32.mxu1 %v3483_v53 }
 0x1d4   :  { %496 = vmatmul.mubr.f32.gmra.mrb[8].mxu1 %v3481_v52 }
 0x1d5   :  { %v3487_v54 = vpop.f32.mrb[10].mxu0 }
 0x1d6   :  { %v2656_v55 = vpack.c.bf16 %v3487_v54, %v3481_v52  ;;  %v3491_v56 = vpop.f32.mrb[11].mxu0 }
 0x1d7   :  { %v2654_v57 = vpack.c.bf16 %v3491_v56, %v3483_v53  ;;  %501 = vmatprep.mubr.f32.mxu1 %v3491_v56 }
 0x1d8   :  { %502 = vmatmul.mubr.f32.gmra.mrb[10].mxu1 %v3487_v54 }
 0x1d9   :  { %v3497_v58 = vpop.f32.mrb[12].mxu0 }
 0x1da   :  { %v3499_v59 = vpop.f32.mrb[13].mxu0 }
 0x1db   :  { %507 = vmatprep.mubr.f32.mxu1 %v3499_v59 }
 0x1dc   :  { %508 = vmatmul.mubr.f32.gmra.mrb[12].mxu1 %v3497_v58 }
 0x1dd   :  { %v3503_v60 = vpop.f32.mrb[14].mxu0 }
 0x1de   :  { %v2660_v61 = vpack.c.bf16 %v3503_v60, %v3497_v58  ;;  %v3507_v62 = vpop.f32.mrb[15].mxu0 }
 0x1df   :  { %v2658_v63 = vpack.c.bf16 %v3507_v62, %v3499_v59  ;;  %513 = vmatprep.mubr.f32.mxu1 %v3507_v62 }
 0x1e0   :  { %514 = vmatmul.mubr.f32.gmra.mrb[14].mxu1 %v3503_v60 }
 0x297   :  { %v473_v9 = vpop.f32.mrb[0].mxu1 }
 0x298   :  { %v880_v10 = vmul.f32 %v873_v7, %v473_v9  ;;  %v475_v11 = vpop.f32.mrb[1].mxu1 }
 0x299   :  { %v881_v12 = vmul.f32 %v877_v8, %v475_v11 }
 0x29b   :  { %v479_v13 = vpop.f32.mrb[2].mxu1  ;;  %v3530_v14 = vadd.f32 %v881_v12, %v880_v10 }
 0x29c   :  { %v2632_v15 = vpack.c.bf16 %v479_v13, %v473_v9  ;;  %v882_v16 = vmul.f32 %v873_v7, %v479_v13  ;;  %v481_v17 = vpop.f32.mrb[3].mxu1 }
 0x29d   :  { %v2630_v18 = vpack.c.bf16 %v481_v17, %v475_v11  ;;  %v883_v19 = vmul.f32 %v877_v8, %v481_v17 }
 0x29f   :  { %v485_v20 = vpop.f32.mrb[4].mxu1  ;;  %2631 = vmatprep.subr.bf16.mxu0 %v2630_v18  ;;  %v3532_v21 = vadd.f32 %v883_v19, %v882_v16 }
 0x2a0   :  { %v884_v22 = vmul.f32 %v873_v7, %v485_v20  ;;  %v487_v23 = vpop.f32.mrb[5].mxu1  ;;  %2633 = vmatpush1.bf16.xpose.msra.mxu0 %v2632_v15 }
 0x2a1   :  { %v885_v24 = vmul.f32 %v877_v8, %v487_v23 }
 0x2a3   :  { %v491_v25 = vpop.f32.mrb[6].mxu1  ;;  %v3534_v26 = vadd.f32 %v885_v24, %v884_v22 }
 0x2a4   :  { %v2636_v27 = vpack.c.bf16 %v491_v25, %v485_v20  ;;  %v886_v28 = vmul.f32 %v873_v7, %v491_v25  ;;  %v493_v29 = vpop.f32.mrb[7].mxu1  ;;  %v530_v25 = vrot.slane %v3519_v2, %v3523_v4  ;;  %v731_v2 = vld [vmem:[#allocation6 + $0x18] sm:$0xff] }
 0x2a5   :  { %v2634_v30 = vpack.c.bf16 %v493_v29, %v487_v23  ;;  %v887_v31 = vmul.f32 %v877_v8, %v493_v29  ;;  %v735_v29 = vld [vmem:[#allocation6 + $0x38] sm:$0xff] }
 0x2a7   :  { %v497_v32 = vpop.f32.mrb[8].mxu1  ;;  %2635 = vmatprep.subr.bf16.mxu0 %v2634_v30  ;;  %v3536_v33 = vadd.f32 %v887_v31, %v886_v28  ;;  %v733_v28 = vld [vmem:[#allocation6 + $0x28] sm:$0xff]  ;;  %v732_v31 = vld [vmem:[#allocation6 + $0x20] sm:$0xff] }
 0x2a8   :  { %v888_v34 = vmul.f32 %v873_v7, %v497_v32  ;;  %v499_v35 = vpop.f32.mrb[9].mxu1  ;;  %2637 = vmatpush1.bf16.xpose.msra.mxu0 %v2636_v27  ;;  %v730_v27 = vld [vmem:[#allocation6 + $0x10] sm:$0xff] }
 0x2a9   :  { %v889_v36 = vmul.f32 %v877_v8, %v499_v35 }
 0x2ab   :  { %v503_v37 = vpop.f32.mrb[10].mxu1  ;;  %v3538_v38 = vadd.f32 %v889_v36, %v888_v34  ;;  %v738_v36 = vld [vmem:[#allocation6 + $0x50] sm:$0xff] }
 0x2ac   :  { %v2640_v39 = vpack.c.bf16 %v503_v37, %v497_v32  ;;  %v890_v0 = vmul.f32 %v873_v7, %v503_v37  ;;  %v505_v3 = vpop.f32.mrb[11].mxu1  ;;  %v737_v32 = vld [vmem:[#allocation6 + $0x48] sm:$0xff] }
 0x2ad   :  { %v2638_v6 = vpack.c.bf16 %v505_v3, %v499_v35  ;;  %v891_v9 = vmul.f32 %v877_v8, %v505_v3  ;;  %v736_v35 = vld [vmem:[#allocation6 + $0x40] sm:$0xff]  ;;  %v741_v37 = vld [vmem:[#allocation6 + $0x68] sm:$0xff] }
 0x2ae   :  { %v740_v3 = vld [vmem:[#allocation6 + $0x60] sm:$0xff] }
 0x2af   :  { %v509_v10 = vpop.f32.mrb[12].mxu1  ;;  %2639 = vmatprep.subr.bf16.mxu0 %v2638_v6  ;;  %v911_v11 = vadd.f32 %v891_v9, %v890_v0  ;;  %v742_v6 = vld [vmem:[#allocation6 + $0x70] sm:$0xff]  ;;  %v745_v9 = vld [vmem:[#allocation6 + $0x88] sm:$0xff] }
 0x2b0   :  { %v892_v12 = vmul.f32 %v873_v7, %v509_v10  ;;  %v511_v13 = vpop.f32.mrb[13].mxu1  ;;  %2641 = vmatpush1.bf16.xpose.msra.mxu0 %v2640_v39  ;;  %v2672_v39 = vpack.c.bf16 %v738_v36, %v736_v35  ;;  %v779_v35 = vld [vmem:[#allocation6 + $0x198] sm:$0xff] }
 0x2b1   :  { %v893_v15 = vmul.f32 %v877_v8, %v511_v13 }
 0x2b3   :  { %v515_v16 = vpop.f32.mrb[14].mxu1  ;;  %v914_v17 = vadd.f32 %v893_v15, %v892_v12  ;;  %v746_v15 = vld [vmem:[#allocation6 + $0x90] sm:$0xff] }
 0x2b4   :  { %v2644_v18 = vpack.c.bf16 %v515_v16, %v509_v10  ;;  %v894_v19 = vmul.f32 %v873_v7, %v515_v16  ;;  %v517_v20 = vpop.f32.mrb[15].mxu1  ;;  %v728_v7 = vld [vmem:[#allocation6] sm:$0xff]  ;;  %v747_v10 = vld [vmem:[#allocation6 + $0x98] sm:$0xff]  ;;  %v749_v16 = vld [vmem:[#allocation6 + $0xa8] sm:$0xff] }
 0x2b5   :  { %v2642_v22 = vpack.c.bf16 %v517_v20, %v511_v13  ;;  %v895_v23 = vmul.f32 %v877_v8, %v517_v20  ;;  %v2664_v30 = vpack.c.bf16 %v730_v27, %v728_v7  ;;  %v2678_v12 = vpack.c.bf16 %v747_v10, %v745_v9  ;;  %v744_v13 = vld [vmem:[#allocation6 + $0x80] sm:$0xff]  ;;  %v769_v7 = vld [vmem:[#allocation6 + $0x148] sm:$0xff] }
 0x2b6   :  { %v748_v20 = vld [vmem:[#allocation6 + $0xa0] sm:$0xff] }
 0x2b7   :  { %2643 = vmatprep.subr.bf16.mxu0 %v2642_v22  ;;  %v917_v24 = vadd.f32 %v895_v23, %v894_v19  ;;  %v750_v22 = vld [vmem:[#allocation6 + $0xb0] sm:$0xff]  ;;  %v753_v23 = vld [vmem:[#allocation6 + $0xc8] sm:$0xff]  ;;  %v780_v10 = vld [vmem:[#allocation6 + $0x1a0] sm:$0xff] }
 0x2b8   :  { %2645 = vmatpush1.bf16.xpose.msra.mxu0 %v2644_v18  ;;  %v2680_v18 = vpack.c.bf16 %v746_v15, %v744_v13  ;;  %v787_v13 = vld [vmem:[#allocation6 + $0x1d8] sm:$0xff] }
 0x2b9   :  { %2647 = vmatprep.subr.bf16.mxu0 %v2646_v45  ;;  %v3575_v45 = vld [vmem:[%s3977_s2] sm:$0xff] }
 0x2ba   :  { %vm122_vm10 = vcmp.gt.f32.partialorder %v3575_v45, 0.0 }
 0x2bf   :  { %602 = vmatmul.mubr.f32.vlgmr.msra.gmra.mrb[16].mxu0 %v530_v25  ;;  %v2684_v25 = vpack.c.bf16 %v750_v22, %v748_v20  ;;  %v791_v20 = vld [vmem:[#allocation6 + $0x1f8] sm:$0xff] }
 0x2c0   :  { %2649 = vmatpush1.bf16.msra.mxu0 %v2648_v43  ;;  %715 = vmatprep.mubr.f32.mxu0 %v3240_v5 }
 0x2c1   :  { %2651 = vmatprep.subr.bf16.mxu0 %v2650_v51 }
 0x2c4   :  { %2653 = vmatpush1.bf16.msra.mxu0 %v2652_v49 }
 0x2c5   :  { %2655 = vmatprep.subr.bf16.mxu0 %v2654_v57 }
 0x2c8   :  { %2657 = vmatpush1.bf16.msra.mxu0 %v2656_v55 }
 0x2c9   :  { %2659 = vmatprep.subr.bf16.mxu0 %v2658_v63  ;;  %v729_v63 = vld [vmem:[#allocation6 + $0x8] sm:$0xff] }
 0x2ca   :  { %v2662_v8 = vpack.c.bf16 %v731_v2, %v729_v63  ;;  %v764_v63 = vld [vmem:[#allocation6 + $0x120] sm:$0xff]  ;;  %v766_v2 = vld [vmem:[#allocation6 + $0x130] sm:$0xff] }
 0x2cb   :  { %v2700_v27 = vpack.c.bf16 %v766_v2, %v764_v63 }
 0x2cc   :  { %2661 = vmatpush1.bf16.msra.mxu0 %v2660_v61  ;;  %2663 = vmatprep.subr.bf16.mxu1 %v2662_v8  ;;  %v771_v8 = vld [vmem:[#allocation6 + $0x158] sm:$0xff] }
 0x2cd   :  { %2665 = vmatpush1.bf16.msra.mxu1 %v2664_v30  ;;  %v770_v30 = vld [vmem:[#allocation6 + $0x150] sm:$0xff] }
 0x392   :  { %v603_v41 = vpop.f32.mrb[16].mxu0 }
 0x393   :  { %v612_v42 = vadd.f32 %v610_v40, %v603_v41  ;;  %v605_v43 = vpop.f32.mrb[17].mxu0  ;;  %v752_v41 = vld [vmem:[#allocation6 + $0xc0] sm:$0xff] }
 0x394   :  { %v757_v43 = vld [vmem:[#allocation6 + $0xe8] sm:$0xff] }
 0x395   :  { %vm613_vm8 = vcmp.gt.f32.partialorder %v612_v42, 0.0  ;;  %v614_v46 = vmul.f32 0.2, %v612_v42 }
 0x397   :  { %v615_v47 = vsel %vm613_vm8, %v612_v42, %v614_v46  ;;  %v754_v42 = vld [vmem:[#allocation6 + $0xd0] sm:$0xff]  ;;  %v759_v46 = vld [vmem:[#allocation6 + $0xf8] sm:$0xff] }
 0x398   :  { %v619_v48 = vrot.slane %v615_v47, %v3523_v4  ;;  %v2688_v47 = vpack.c.bf16 %v754_v42, %v752_v41 }
 0x39a   :  { %v621_v49 = vsel %vm123_vm9, %v619_v48, -9e+15  ;;  %v620_v50 = vsel %vm122_vm10, %v619_v48, -9e+15  ;;  %v2690_v48 = vpack.c.bf16 %v759_v46, %v757_v43  ;;  %v788_v46 = vld [vmem:[#allocation6 + $0x1e0] sm:$0xff] }
 0x39b   :  { %v626_v51 = vsel %vm622_vm11, %v621_v49, -inf  ;;  %v623_v52 = vsel %vm622_vm11, %v620_v50, -inf }
 0x39c   :  { %627 = vmax.xlane.f32.xlu0 %v626_v51  ;;  %624 = vmax.xlane.f32.xlu1 %v623_v52  ;;  %v761_v51 = vld [vmem:[#allocation6 + $0x108] sm:$0xff]  ;;  %v763_v52 = vld [vmem:[#allocation6 + $0x118] sm:$0xff] }
 0x429   :  { %v628_v53 = vpop.xlane.xlu0 %627  ;;  %v625_v54 = vpop.xlane.xlu1 %624 }
 0x42a   :  { %v630_v55 = vsub.f32 %v621_v49, %v628_v53  ;;  %v629_v56 = vsub.f32 %v620_v50, %v625_v54  ;;  %v756_v49 = vld [vmem:[#allocation6 + $0xe0] sm:$0xff]  ;;  %v758_v50 = vld [vmem:[#allocation6 + $0xf0] sm:$0xff]  ;;  %v2694_v54 = vpack.c.bf16 %v763_v52, %v761_v51 }
 0x42b   :  { %v2692_v53 = vpack.c.bf16 %v758_v50, %v756_v49 }
 0x42c   :  { %v633_v57 = vmul.f32 1.442695, %v630_v55  ;;  %v631_v58 = vmul.f32 1.442695, %v629_v56  ;;  %v760_v55 = vld [vmem:[#allocation6 + $0x100] sm:$0xff]  ;;  %v762_v56 = vld [vmem:[#allocation6 + $0x110] sm:$0xff] }
 0x42e   :  { %2979 = vpow2.f32 %v633_v57  ;;  %v765_v57 = vld [vmem:[#allocation6 + $0x128] sm:$0xff] }
 0x42f   :  { %2981 = vpow2.f32 %v631_v58  ;;  %v767_v58 = vld [vmem:[#allocation6 + $0x138] sm:$0xff] }
 0x438   :  { %v3586_v59 = vpop.eup %2979 }
 0x439   :  { %v3588_v60 = vpop.eup %2981  ;;  %v638_v61 = vsel %vm622_vm11, %v3586_v59, 0.0 }
 0x43a   :  { %639 = vadd.xlane.f32.xlu1 %v638_v61  ;;  %v635_v62 = vsel %vm622_vm11, %v3588_v60, 0.0  ;;  %v2696_v61 = vpack.c.bf16 %v762_v56, %v760_v55 }
 0x43b   :  { %636 = vadd.xlane.f32.xlu0 %v635_v62  ;;  %v2698_v62 = vpack.c.bf16 %v767_v58, %v765_v57 }
 0x43e   :  { %900 = vadd.xlane.f32.xlu1 %v3532_v21  ;;  %v2666_v21 = vpack.c.bf16 %v735_v29, %v733_v28  ;;  %v2702_v28 = vpack.c.bf16 %v771_v8, %v769_v7  ;;  %v768_v29 = vld [vmem:[#allocation6 + $0x140] sm:$0xff] }
 0x43f   :  { %897 = vadd.xlane.f32.xlu0 %v3530_v14  ;;  %v734_v14 = vld [vmem:[#allocation6 + $0x30] sm:$0xff] }
 0x440   :  { %2667 = vmatprep.subr.bf16.mxu1 %v2666_v21  ;;  %v773_v21 = vld [vmem:[#allocation6 + $0x168] sm:$0xff] }
 0x442   :  { %906 = vadd.xlane.f32.xlu1 %v3536_v33  ;;  %v739_v33 = vld [vmem:[#allocation6 + $0x58] sm:$0xff] }
 0x443   :  { %903 = vadd.xlane.f32.xlu0 %v3534_v26  ;;  %v2668_v26 = vpack.c.bf16 %v734_v14, %v732_v31  ;;  %v2670_v34 = vpack.c.bf16 %v739_v33, %v737_v32  ;;  %v775_v31 = vld [vmem:[#allocation6 + $0x178] sm:$0xff]  ;;  %v2704_v14 = vpack.c.bf16 %v770_v30, %v768_v29  ;;  %v772_v33 = vld [vmem:[#allocation6 + $0x160] sm:$0xff] }
 0x444   :  { %v2706_v32 = vpack.c.bf16 %v775_v31, %v773_v21  ;;  %v3613_v30 = vld [vmem:[%s3978_s3] sm:$0xff]  ;;  %v3618_v21 = vld [vmem:[%s3978_s3 + $0x8] sm:$0xff]  ;;  %v3623_v31 = vld [vmem:[%s3978_s3 + $0x10] sm:$0xff] }
 0x445   :  { %2669 = vmatpush1.bf16.msra.mxu1 %v2668_v26  ;;  %v774_v26 = vld [vmem:[#allocation6 + $0x170] sm:$0xff]  ;;  %vm132_vm12 = vcmp.gt.f32.partialorder %v3613_v30, 0.0  ;;  %vm133_vm14 = vcmp.gt.f32.partialorder %v3618_v21, 0.0  ;;  %vm134_vm15 = vcmp.gt.f32.partialorder %v3623_v31, 0.0 }
 0x446   :  { %912 = vadd.xlane.f32.xlu1 %v911_v11  ;;  %2671 = vmatprep.subr.bf16.mxu1 %v2670_v34  ;;  %v2676_v11 = vpack.c.bf16 %v742_v6, %v740_v3  ;;  %v777_v34 = vld [vmem:[#allocation6 + $0x188] sm:$0xff]  ;;  %v2708_v36 = vpack.c.bf16 %v774_v26, %v772_v33  ;;  %v783_v3 = vld [vmem:[#allocation6 + $0x1b8] sm:$0xff] }
 0x447   :  { %909 = vadd.xlane.f32.xlu0 %v3538_v38  ;;  %v743_v38 = vld [vmem:[#allocation6 + $0x78] sm:$0xff] }
 0x448   :  { %v2674_v0 = vpack.c.bf16 %v743_v38, %v741_v37  ;;  %v2710_v37 = vpack.c.bf16 %v779_v35, %v777_v34  ;;  %v776_v38 = vld [vmem:[#allocation6 + $0x180] sm:$0xff] }
 0x449   :  { %2673 = vmatpush1.bf16.msra.mxu1 %v2672_v39  ;;  %v778_v39 = vld [vmem:[#allocation6 + $0x190] sm:$0xff] }
 0x44a   :  { %918 = vadd.xlane.f32.xlu1 %v917_v24  ;;  %2675 = vmatprep.subr.bf16.mxu1 %v2674_v0  ;;  %v755_v24 = vld [vmem:[#allocation6 + $0xd8] sm:$0xff]  ;;  %v781_v0 = vld [vmem:[#allocation6 + $0x1a8] sm:$0xff]  ;;  %v2712_v6 = vpack.c.bf16 %v778_v39, %v776_v38 }
 0x44b   :  { %915 = vadd.xlane.f32.xlu0 %v914_v17  ;;  %v751_v17 = vld [vmem:[#allocation6 + $0xb8] sm:$0xff]  ;;  %v2686_v40 = vpack.c.bf16 %v755_v24, %v753_v23  ;;  %v2714_v9 = vpack.c.bf16 %v783_v3, %v781_v0 }
 0x44c   :  { %v2682_v19 = vpack.c.bf16 %v751_v17, %v749_v16  ;;  %v784_v17 = vld [vmem:[#allocation6 + $0x1c0] sm:$0xff] }
 0x44d   :  { %2677 = vmatpush1.bf16.msra.mxu1 %v2676_v11  ;;  %v782_v11 = vld [vmem:[#allocation6 + $0x1b0] sm:$0xff] }
 0x44e   :  { %2679 = vmatprep.subr.bf16.mxu1 %v2678_v12  ;;  %v785_v12 = vld [vmem:[#allocation6 + $0x1c8] sm:$0xff]  ;;  %v2716_v15 = vpack.c.bf16 %v782_v11, %v780_v10 }
 0x44f   :  { %v2718_v16 = vpack.c.bf16 %v787_v13, %v785_v12 }
 0x451   :  { %2681 = vmatpush1.bf16.msra.mxu1 %v2680_v18  ;;  %v786_v18 = vld [vmem:[#allocation6 + $0x1d0] sm:$0xff] }
 0x452   :  { %2683 = vmatprep.subr.bf16.mxu1 %v2682_v19  ;;  %v789_v19 = vld [vmem:[#allocation6 + $0x1e8] sm:$0xff]  ;;  %v2720_v22 = vpack.c.bf16 %v786_v18, %v784_v17 }
 0x453   :  { %v2722_v23 = vpack.c.bf16 %v791_v20, %v789_v19 }
 0x455   :  { %2685 = vmatpush1.bf16.msra.mxu1 %v2684_v25 }
 0x456   :  { %2687 = vmatprep.subr.bf16.mxu1 %v2686_v40 }
 0x459   :  { %2689 = vmatpush1.bf16.msra.mxu1 %v2688_v47  ;;  %v790_v47 = vld [vmem:[#allocation6 + $0x1f0] sm:$0xff] }
 0x45a   :  { %2691 = vmatprep.subr.bf16.mxu1 %v2690_v48  ;;  %v2724_v48 = vpack.c.bf16 %v790_v47, %v788_v46  ;;  %v3661_v47 = vld [vmem:[%s3978_s3 + $0x30] sm:$0xff] }
 0x45d   :  { %2693 = vmatpush1.bf16.msra.mxu1 %v2692_v53 }
 0x45e   :  { %2695 = vmatprep.subr.bf16.mxu1 %v2694_v54 }
 0x461   :  { %2697 = vmatpush1.bf16.msra.mxu1 %v2696_v61 }
 0x462   :  { %2699 = vmatprep.subr.bf16.mxu1 %v2698_v62 }
 0x465   :  { %2701 = vmatpush1.bf16.msra.mxu1 %v2700_v27 }
 0x466   :  { %2703 = vmatprep.subr.bf16.mxu1 %v2702_v28 }
 0x469   :  { %2705 = vmatpush1.bf16.msra.mxu1 %v2704_v14  ;;  %v3628_v14 = vld [vmem:[%s3978_s3 + $0x18] sm:$0xff] }
 0x46a   :  { %2707 = vmatprep.subr.bf16.mxu1 %v2706_v32  ;;  %vm135_vm0 = vcmp.gt.f32.partialorder %v3628_v14, 0.0 }
 0x46d   :  { %2709 = vmatpush1.bf16.msra.mxu1 %v2708_v36 }
 0x46e   :  { %2711 = vmatprep.subr.bf16.mxu1 %v2710_v37 }
 0x471   :  { %2713 = vmatpush1.bf16.msra.mxu1 %v2712_v6 }
 0x472   :  { %2715 = vmatprep.subr.bf16.mxu1 %v2714_v9 }
 0x475   :  { %2717 = vmatpush1.bf16.msra.mxu1 %v2716_v15 }
 0x476   :  { %2719 = vmatprep.subr.bf16.mxu1 %v2718_v16 }
 0x479   :  { %2721 = vmatpush1.bf16.msra.mxu1 %v2720_v22 }
 0x47a   :  { %2723 = vmatprep.subr.bf16.mxu1 %v2722_v23  ;;  %v3642_v23 = vld [vmem:[%s3978_s3 + $0x20] sm:$0xff] }
 0x47b   :  { %vm136_vm7 = vcmp.gt.f32.partialorder %v3642_v23, 0.0 }
 0x47d   :  { %2725 = vmatpush1.bf16.msra.mxu1 %v2724_v48  ;;  %v3666_v48 = vld [vmem:[%s3978_s3 + $0x38] sm:$0xff] }
 0x4c7   :  { %v640_v25 = vpop.xlane.xlu1 %639 }
 0x4c8   :  { %v637_v24 = vpop.xlane.xlu0 %636 }
 0x4c9   :  { %2983 = vrcp.f32 %v637_v24  ;;  %v3647_v24 = vld [vmem:[%s3978_s3 + $0x28] sm:$0xff] }
 0x4ca   :  { %2985 = vrcp.f32 %v640_v25  ;;  %vm137_vm8 = vcmp.gt.f32.partialorder %v3647_v24, 0.0 }
 0x4cb   :  { %v901_v7 = vpop.xlane.xlu1 %900 }
 0x4cc   :  { %v898_v2 = vpop.xlane.xlu0 %897 }
 0x4cf   :  { %v907_v27 = vpop.xlane.xlu1 %906 }
 0x4d0   :  { %v904_v8 = vpop.xlane.xlu0 %903 }
 0x4d3   :  { %v2984_v40 = vpop.eup %2983  ;;  %v913_v29 = vpop.xlane.xlu1 %912 }
 0x4d4   :  { %v642_v41 = vmul.f32 %v2984_v40, %v3588_v60  ;;  %v2986_v42 = vpop.eup %2985  ;;  %v910_v28 = vpop.xlane.xlu0 %909 }
 0x4d5   :  { %v644_v43 = vmul.f32 %v2986_v42, %v3586_v59  ;;  %v2495_v59 = vld [vmem:[%s3981_s6 + $0x2] ss:$8 sm:$0x3] }
 0x4d6   :  { %2496 = vmatmul.mubr.msk.f32.vlgmr.msra.gmra.mrb[18].mxu0 %vm622_vm11, %v642_v41  ;;  %v928_v54 = vrot.slane %v2495_v59, %v3514_v1  ;;  %v924_v63 = vrot.slane %v2495_v59, %v3523_v4 }
 0x4d7   :  { %721 = vmatprep.mubr.f32.mxu0 %v3240_v5  ;;  %v919_v35 = vpop.xlane.xlu1 %918 }
 0x4d8   :  { %v916_v34 = vpop.xlane.xlu0 %915 }
 0x4da   :  { %2497 = vmatmul.mubr.msk.f32.gmra.mrb[20].mxu0 %vm622_vm11, %v644_v43 }
 0x4db   :  { %995 = vmatprep.mubr.f32.mxu0 %v928_v54 }
 0x5a9   :  { %v717_v49 = vpop.f32.mrb[18].mxu0 }
 0x5aa   :  { %v719_v50 = vpop.f32.mrb[19].mxu0 }
 0x5ab   :  { %856 = vmatprep.mubr.f32.mxu1 %v719_v50 }
 0x5ac   :  { %857 = vmatmul.mubr.f32.vlgmr.msra.gmra.mrb[16].mxu1 %v717_v49 }
 0x5ad   :  { %v723_v51 = vpop.f32.mrb[20].mxu0 }
 0x5ae   :  { %v2732_v52 = vpack.c.bf16 %v723_v51, %v717_v49  ;;  %v725_v60 = vpop.f32.mrb[21].mxu0 }
 0x5af   :  { %v2730_v53 = vpack.c.bf16 %v725_v60, %v719_v50  ;;  %862 = vmatprep.mubr.f32.mxu1 %v725_v60 }
 0x5b0   :  { %863 = vmatmul.mubr.f32.gmra.mrb[18].mxu1 %v723_v51 }
 0x67f   :  { %v858_v55 = vpop.f32.mrb[16].mxu1 }
 0x680   :  { %v860_v56 = vpop.f32.mrb[17].mxu1 }
 0x683   :  { %v864_v57 = vpop.f32.mrb[18].mxu1 }
 0x684   :  { %v2728_v58 = vpack.c.bf16 %v864_v57, %v858_v55  ;;  %v866_v61 = vpop.f32.mrb[19].mxu1 }
 0x685   :  { %v2726_v62 = vpack.c.bf16 %v866_v61, %v860_v56 }
 0x687   :  { %2727 = vmatprep.subr.bf16.mxu0 %v2726_v62 }
 0x688   :  { %2729 = vmatpush1.bf16.xpose.msra.mxu0 %v2728_v58 }
 0x689   :  { %2731 = vmatprep.subr.bf16.mxu0 %v2730_v53 }
 0x68f   :  { %996 = vmatmul.mubr.f32.vlgmr.msra.gmra.mrb[22].mxu0 %v924_v63 }
 0x690   :  { %2733 = vmatpush1.bf16.msra.mxu0 %v2732_v52  ;;  %1222 = vmatprep.mubr.f32.mxu0 %v3240_v5 }
 0x762   :  { %v997_v32 = vpop.f32.mrb[22].mxu0 }
 0x763   :  { %v1004_v33 = vrot.slane %v997_v32, %v3523_v4  ;;  %v999_v26 = vpop.f32.mrb[23].mxu0 }
 0x765   :  { %v1005_v36 = vadd.f32 %v1004_v33, %v898_v2  ;;  %v1006_v37 = vadd.f32 %v1004_v33, %v901_v7  ;;  %v1007_v38 = vadd.f32 %v1004_v33, %v904_v8  ;;  %v1008_v39 = vadd.f32 %v1004_v33, %v907_v27 }
 0x766   :  { %v1009_v0 = vadd.f32 %v1004_v33, %v910_v28  ;;  %v1010_v3 = vadd.f32 %v1004_v33, %v913_v29  ;;  %v1011_v6 = vadd.f32 %v1004_v33, %v916_v34  ;;  %v1012_v9 = vadd.f32 %v1004_v33, %v919_v35 }
 0x767   :  { %vm1013_vm1 = vcmp.gt.f32.partialorder %v1005_v36, 0.0  ;;  %v1021_v10 = vmul.f32 0.2, %v1005_v36  ;;  %vm1014_vm2 = vcmp.gt.f32.partialorder %v1006_v37, 0.0  ;;  %v1022_v11 = vmul.f32 0.2, %v1006_v37 }
 0x768   :  { %vm1015_vm3 = vcmp.gt.f32.partialorder %v1007_v38, 0.0  ;;  %v1023_v12 = vmul.f32 0.2, %v1007_v38  ;;  %vm1016_vm4 = vcmp.gt.f32.partialorder %v1008_v39, 0.0  ;;  %v1024_v13 = vmul.f32 0.2, %v1008_v39 }
 0x769   :  { %v1029_v15 = vsel %vm1013_vm1, %v1005_v36, %v1021_v10  ;;  %v1030_v16 = vsel %vm1014_vm2, %v1006_v37, %v1022_v11  ;;  %vm1017_vm5 = vcmp.gt.f32.partialorder %v1009_v0, 0.0  ;;  %v1025_v17 = vmul.f32 0.2, %v1009_v0 }
 0x76a   :  { %v1037_v18 = vsel %vm132_vm12, %v1029_v15, -9e+15  ;;  %v1038_v19 = vsel %vm133_vm14, %v1030_v16, -9e+15  ;;  %v1031_v20 = vsel %vm1015_vm3, %v1007_v38, %v1023_v12  ;;  %v1032_v22 = vsel %vm1016_vm4, %v1008_v39, %v1024_v13 }
 0x76b   :  { %v1046_v25 = vsel %vm1045_vm13, %v1037_v18, -inf  ;;  %v1049_v40 = vsel %vm1045_vm13, %v1038_v19, -inf  ;;  %v1039_v41 = vsel %vm134_vm15, %v1031_v20, -9e+15  ;;  %v1040_v42 = vsel %vm135_vm0, %v1032_v22, -9e+15 }
 0x76c   :  { %1047 = vmax.xlane.f32.xlu0 %v1046_v25  ;;  %1050 = vmax.xlane.f32.xlu1 %v1049_v40  ;;  %vm1018_vm6 = vcmp.gt.f32.partialorder %v1010_v3, 0.0  ;;  %v1033_v43 = vsel %vm1017_vm5, %v1009_v0, %v1025_v17  ;;  %v1026_v46 = vmul.f32 0.2, %v1010_v3  ;;  %vm1019_vm1 = vcmp.gt.f32.partialorder %v1011_v6, 0.0 }
 0x76d   :  { %v1027_v49 = vmul.f32 0.2, %v1011_v6  ;;  %vm1020_vm2 = vcmp.gt.f32.partialorder %v1012_v9, 0.0  ;;  %v1028_v50 = vmul.f32 0.2, %v1012_v9  ;;  %v1052_v51 = vsel %vm1045_vm13, %v1039_v41, -inf }
 0x76e   :  { %v1055_v52 = vsel %vm1045_vm13, %v1040_v42, -inf  ;;  %v1034_v60 = vsel %vm1018_vm6, %v1010_v3, %v1026_v46  ;;  %v1041_v53 = vsel %vm136_vm7, %v1033_v43, -9e+15  ;;  %vm138_vm3 = vcmp.gt.f32.partialorder %v3661_v47, 0.0 }
 0x76f   :  { %v1042_v59 = vsel %vm137_vm8, %v1034_v60, -9e+15  ;;  %v1035_v54 = vsel %vm1019_vm1, %v1011_v6, %v1027_v49  ;;  %vm139_vm4 = vcmp.gt.f32.partialorder %v3666_v48, 0.0  ;;  %v1036_v55 = vsel %vm1020_vm2, %v1012_v9, %v1028_v50  ;;  %v1710_v60 = vld [vmem:[%s3985_s10 + $0x3] ss:$0 sm:$0xff] }
 0x770   :  { %1053 = vmax.xlane.f32.xlu0 %v1052_v51  ;;  %1056 = vmax.xlane.f32.xlu1 %v1055_v52  ;;  %v1058_v56 = vsel %vm1045_vm13, %v1041_v53, -inf  ;;  %v1061_v57 = vsel %vm1045_vm13, %v1042_v59, -inf  ;;  %v1043_v58 = vsel %vm138_vm3, %v1035_v54, -9e+15  ;;  %v1044_v61 = vsel %vm139_vm4, %v1036_v55, -9e+15 }
 0x771   :  { %v1064_v62 = vsel %vm1045_vm13, %v1043_v58, -inf  ;;  %v1067_v63 = vsel %vm1045_vm13, %v1044_v61, -inf  ;;  %v1529_v54 = vld [vmem:[#allocation7 + $0x8] sm:$0xff] }
 0x774   :  { %1059 = vmax.xlane.f32.xlu0 %v1058_v56  ;;  %1062 = vmax.xlane.f32.xlu1 %v1061_v57  ;;  %v1531_v56 = vld [vmem:[#allocation7 + $0x18] sm:$0xff] }
 0x775   :  { %v2798_v57 = vpack.c.bf16 %v1531_v56, %v1529_v54  ;;  %v1559_v54 = vld [vmem:[#allocation7 + $0xf8] sm:$0xff] }
 0x777   :  { %2799 = vmatprep.subr.bf16.mxu1 %v2798_v57  ;;  %v1556_v57 = vld [vmem:[#allocation7 + $0xe0] sm:$0xff] }
 0x778   :  { %1065 = vmax.xlane.f32.xlu0 %v1064_v62  ;;  %1068 = vmax.xlane.f32.xlu1 %v1067_v63  ;;  %v1533_v63 = vld [vmem:[#allocation7 + $0x28] sm:$0xff] }
 0x7f9   :  { %v1048_v2 = vpop.xlane.xlu0 %1047  ;;  %v1051_v7 = vpop.xlane.xlu1 %1050 }
 0x7fa   :  { %v1070_v8 = vsub.f32 %v1037_v18, %v1048_v2  ;;  %v1071_v27 = vsub.f32 %v1038_v19, %v1051_v7  ;;  %v1535_v2 = vld [vmem:[#allocation7 + $0x38] sm:$0xff] }
 0x7fb   :  { %v2802_v7 = vpack.c.bf16 %v1535_v2, %v1533_v63 }
 0x7fc   :  { %v1078_v28 = vmul.f32 1.442695, %v1070_v8  ;;  %v1080_v29 = vmul.f32 1.442695, %v1071_v27  ;;  %v1532_v8 = vld [vmem:[#allocation7 + $0x20] sm:$0xff]  ;;  %v1534_v27 = vld [vmem:[#allocation7 + $0x30] sm:$0xff] }
 0x7fd   :  { %v1054_v32 = vpop.xlane.xlu0 %1053  ;;  %v1057_v33 = vpop.xlane.xlu1 %1056 }
 0x7fe   :  { %2987 = vpow2.f32 %v1078_v28  ;;  %v1072_v26 = vsub.f32 %v1039_v41, %v1054_v32  ;;  %v1073_v34 = vsub.f32 %v1040_v42, %v1057_v33  ;;  %v2804_v28 = vpack.c.bf16 %v1534_v27, %v1532_v8  ;;  %v1539_v32 = vld [vmem:[#allocation7 + $0x58] sm:$0xff]  ;;  %v1562_v8 = vld [vmem:[#allocation7 + $0x110] sm:$0xff]  ;;  %v1565_v27 = vld [vmem:[#allocation7 + $0x128] sm:$0xff] }
 0x7ff   :  { %2989 = vpow2.f32 %v1080_v29  ;;  %v1537_v29 = vld [vmem:[#allocation7 + $0x48] sm:$0xff] }
 0x800   :  { %v1082_v35 = vmul.f32 1.442695, %v1072_v26  ;;  %v1084_v36 = vmul.f32 1.442695, %v1073_v34  ;;  %v2806_v33 = vpack.c.bf16 %v1539_v32, %v1537_v29  ;;  %v1536_v26 = vld [vmem:[#allocation7 + $0x40] sm:$0xff]  ;;  %v1538_v34 = vld [vmem:[#allocation7 + $0x50] sm:$0xff] }
 0x801   :  { %v1060_v37 = vpop.xlane.xlu0 %1059  ;;  %v1063_v38 = vpop.xlane.xlu1 %1062 }
 0x802   :  { %2991 = vpow2.f32 %v1082_v35  ;;  %v1074_v39 = vsub.f32 %v1041_v53, %v1060_v37  ;;  %v1075_v0 = vsub.f32 %v1042_v59, %v1063_v38  ;;  %v1352_v53 = vld [vmem:[#allocation9 + $0x8] sm:$0xff]  ;;  %v1354_v59 = vld [vmem:[#allocation9 + $0x18] sm:$0xff] }
 0x803   :  { %2993 = vpow2.f32 %v1084_v36  ;;  %v2734_v55 = vpack.c.bf16 %v1354_v59, %v1352_v53  ;;  %v1541_v35 = vld [vmem:[#allocation7 + $0x68] sm:$0xff]  ;;  %v2808_v36 = vpack.c.bf16 %v1538_v34, %v1536_v26  ;;  %v1543_v37 = vld [vmem:[#allocation7 + $0x78] sm:$0xff]  ;;  %v1554_v53 = vld [vmem:[#allocation7 + $0xd0] sm:$0xff] }
 0x804   :  { %v1086_v3 = vmul.f32 1.442695, %v1074_v39  ;;  %v1088_v6 = vmul.f32 1.442695, %v1075_v0  ;;  %v2810_v38 = vpack.c.bf16 %v1543_v37, %v1541_v35  ;;  %v1540_v39 = vld [vmem:[#allocation7 + $0x60] sm:$0xff]  ;;  %v1542_v0 = vld [vmem:[#allocation7 + $0x70] sm:$0xff] }
 0x805   :  { %v1066_v9 = vpop.xlane.xlu0 %1065  ;;  %v1069_v10 = vpop.xlane.xlu1 %1068  ;;  %2735 = vmatprep.subr.bf16.mxu0 %v2734_v55  ;;  %v1557_v59 = vld [vmem:[#allocation7 + $0xe8] sm:$0xff]  ;;  %v1566_v26 = vld [vmem:[#allocation7 + $0x130] sm:$0xff]  ;;  %v1571_v35 = vld [vmem:[#allocation7 + $0x158] sm:$0xff] }
 0x806   :  { %2995 = vpow2.f32 %v1086_v3  ;;  %v1076_v11 = vsub.f32 %v1043_v58, %v1066_v9  ;;  %v1077_v12 = vsub.f32 %v1044_v61, %v1069_v10  ;;  %v1528_v58 = vld [vmem:[#allocation7] sm:$0xff]  ;;  %v1530_v61 = vld [vmem:[#allocation7 + $0x10] sm:$0xff]  ;;  %v1545_v3 = vld [vmem:[#allocation7 + $0x88] sm:$0xff]  ;;  %v2812_v9 = vpack.c.bf16 %v1542_v0, %v1540_v39 }
 0x807   :  { %2997 = vpow2.f32 %v1088_v6  ;;  %v2800_v62 = vpack.c.bf16 %v1530_v61, %v1528_v58  ;;  %v1547_v6 = vld [vmem:[#allocation7 + $0x98] sm:$0xff]  ;;  %v2826_v56 = vpack.c.bf16 %v1559_v54, %v1557_v59  ;;  %v1558_v58 = vld [vmem:[#allocation7 + $0xf0] sm:$0xff]  ;;  %v1561_v61 = vld [vmem:[#allocation7 + $0x108] sm:$0xff] }
 0x808   :  { %v3684_v13 = vpop.eup %2987  ;;  %v1090_v15 = vmul.f32 1.442695, %v1076_v11  ;;  %v1092_v16 = vmul.f32 1.442695, %v1077_v12  ;;  %v2814_v10 = vpack.c.bf16 %v1547_v6, %v1545_v3  ;;  %v1544_v11 = vld [vmem:[#allocation7 + $0x80] sm:$0xff]  ;;  %v1546_v12 = vld [vmem:[#allocation7 + $0x90] sm:$0xff]  ;;  %v2828_v63 = vpack.c.bf16 %v1558_v58, %v1556_v57 }
 0x809   :  { %v3686_v17 = vpop.eup %2989  ;;  %v1094_v18 = vsel %vm1045_vm13, %v3684_v13, 0.0  ;;  %2801 = vmatpush1.bf16.msra.mxu1 %v2800_v62  ;;  %v1563_v62 = vld [vmem:[#allocation7 + $0x118] sm:$0xff]  ;;  %v1569_v34 = vld [vmem:[#allocation7 + $0x148] sm:$0xff]  ;;  %v1570_v39 = vld [vmem:[#allocation7 + $0x150] sm:$0xff] }
 0x80a   :  { %2999 = vpow2.f32 %v1090_v15  ;;  %1095 = vadd.xlane.f32.xlu0 %v1094_v18  ;;  %v1097_v19 = vsel %vm1045_vm13, %v3686_v17, 0.0  ;;  %2803 = vmatprep.subr.bf16.mxu1 %v2802_v7  ;;  %v1549_v15 = vld [vmem:[#allocation7 + $0xa8] sm:$0xff]  ;;  %v2816_v18 = vpack.c.bf16 %v1546_v12, %v1544_v11  ;;  %v2830_v2 = vpack.c.bf16 %v1563_v62, %v1561_v61  ;;  %v1560_v7 = vld [vmem:[#allocation7 + $0x100] sm:$0xff]  ;;  %v1575_v3 = vld [vmem:[#allocation7 + $0x178] sm:$0xff] }
 0x80b   :  { %3001 = vpow2.f32 %v1092_v16  ;;  %1098 = vadd.xlane.f32.xlu1 %v1097_v19  ;;  %v1551_v16 = vld [vmem:[#allocation7 + $0xb8] sm:$0xff]  ;;  %v2832_v29 = vpack.c.bf16 %v1562_v8, %v1560_v7  ;;  %v2838_v37 = vpack.c.bf16 %v1571_v35, %v1569_v34  ;;  %v1573_v0 = vld [vmem:[#allocation7 + $0x168] sm:$0xff]  ;;  %v1361_v62 = vld [vmem:[#allocation9 + $0x50] sm:$0xff] }
 0x80c   :  { %v3692_v20 = vpop.eup %2991  ;;  %v2818_v19 = vpack.c.bf16 %v1551_v16, %v1549_v15  ;;  %v1351_v16 = vld [vmem:[#allocation9] sm:$0xff]  ;;  %v1360_v54 = vld [vmem:[#allocation9 + $0x48] sm:$0xff]  ;;  %v1366_v7 = vld [vmem:[#allocation9 + $0x78] sm:$0xff] }
 0x80d   :  { %v3694_v22 = vpop.eup %2993  ;;  %v1100_v25 = vsel %vm1045_vm13, %v3692_v20, 0.0  ;;  %2805 = vmatpush1.bf16.msra.mxu1 %v2804_v28  ;;  %v1567_v28 = vld [vmem:[#allocation7 + $0x138] sm:$0xff] }
 0x80e   :  { %1101 = vadd.xlane.f32.xlu0 %v1100_v25  ;;  %v1103_v40 = vsel %vm1045_vm13, %v3694_v22, 0.0  ;;  %2807 = vmatprep.subr.bf16.mxu1 %v2806_v33  ;;  %v1548_v25 = vld [vmem:[#allocation7 + $0xa0] sm:$0xff]  ;;  %v2834_v32 = vpack.c.bf16 %v1567_v28, %v1565_v27  ;;  %v1370_v34 = vld [vmem:[#allocation9 + $0x98] sm:$0xff] }
 0x80f   :  { %1104 = vadd.xlane.f32.xlu1 %v1103_v40  ;;  %v1550_v40 = vld [vmem:[#allocation7 + $0xb0] sm:$0xff]  ;;  %v1564_v33 = vld [vmem:[#allocation7 + $0x120] sm:$0xff] }
 0x810   :  { %v3700_v41 = vpop.eup %2995 }
 0x811   :  { %v3702_v42 = vpop.eup %2997  ;;  %v1106_v43 = vsel %vm1045_vm13, %v3700_v41, 0.0  ;;  %2809 = vmatpush1.bf16.msra.mxu1 %v2808_v36  ;;  %v2836_v36 = vpack.c.bf16 %v1566_v26, %v1564_v33  ;;  %v1368_v26 = vld [vmem:[#allocation9 + $0x88] sm:$0xff] }
 0x812   :  { %1107 = vadd.xlane.f32.xlu0 %v1106_v43  ;;  %v1109_v46 = vsel %vm1045_vm13, %v3702_v42, 0.0  ;;  %2811 = vmatprep.subr.bf16.mxu1 %v2810_v38  ;;  %v1553_v43 = vld [vmem:[#allocation7 + $0xc8] sm:$0xff]  ;;  %v1568_v38 = vld [vmem:[#allocation7 + $0x140] sm:$0xff] }
 0x813   :  { %1110 = vadd.xlane.f32.xlu1 %v1109_v46  ;;  %v1555_v46 = vld [vmem:[#allocation7 + $0xd8] sm:$0xff]  ;;  %v2840_v6 = vpack.c.bf16 %v1570_v39, %v1568_v38  ;;  %v2750_v38 = vpack.c.bf16 %v1370_v34, %v1368_v26  ;;  %v1369_v39 = vld [vmem:[#allocation9 + $0x90] sm:$0xff]  ;;  %v1396_v34 = vld [vmem:[#allocation9 + $0x168] sm:$0xff] }
 0x814   :  { %v3708_v49 = vpop.eup %2999  ;;  %v1393_v26 = vld [vmem:[#allocation9 + $0x150] sm:$0xff] }
 0x815   :  { %v3710_v50 = vpop.eup %3001  ;;  %v1112_v51 = vsel %vm1045_vm13, %v3708_v49, 0.0  ;;  %2813 = vmatpush1.bf16.msra.mxu1 %v2812_v9  ;;  %v2842_v9 = vpack.c.bf16 %v1575_v3, %v1573_v0  ;;  %v1372_v3 = vld [vmem:[#allocation9 + $0xa8] sm:$0xff] }
 0x816   :  { %1113 = vadd.xlane.f32.xlu0 %v1112_v51  ;;  %v1115_v52 = vsel %vm1045_vm13, %v3710_v50, 0.0  ;;  %2815 = vmatprep.subr.bf16.mxu1 %v2814_v10  ;;  %v2820_v51 = vpack.c.bf16 %v1550_v40, %v1548_v25  ;;  %v1358_v25 = vld [vmem:[#allocation9 + $0x38] sm:$0xff] }
 0x817   :  { %1116 = vadd.xlane.f32.xlu1 %v1115_v52  ;;  %v2822_v52 = vpack.c.bf16 %v1555_v46, %v1553_v43 }
 0x819   :  { %2817 = vmatpush1.bf16.msra.mxu1 %v2816_v18  ;;  %v1353_v18 = vld [vmem:[#allocation9 + $0x10] sm:$0xff] }
 0x81a   :  { %2819 = vmatprep.subr.bf16.mxu1 %v2818_v19  ;;  %v1356_v19 = vld [vmem:[#allocation9 + $0x28] sm:$0xff]  ;;  %v2736_v43 = vpack.c.bf16 %v1353_v18, %v1351_v16  ;;  %v1378_v18 = vld [vmem:[#allocation9 + $0xd8] sm:$0xff] }
 0x81b   :  { %v1376_v16 = vld [vmem:[#allocation9 + $0xc8] sm:$0xff] }
 0x81d   :  { %2821 = vmatpush1.bf16.msra.mxu1 %v2820_v51 }
 0x81e   :  { %2823 = vmatprep.subr.bf16.mxu1 %v2822_v52  ;;  %v2738_v52 = vpack.c.bf16 %v1358_v25, %v1356_v19 }
 0x82c   :  { %1794 = vperm.xlu0 %2977, %v1710_v60   ;;  %v1552_v60 = vld [vmem:[#allocation7 + $0xc0] sm:$0xff] }
 0x82d   :  { %v2824_v55 = vpack.c.bf16 %v1554_v53, %v1552_v60  ;;  %v1355_v60 = vld [vmem:[#allocation9 + $0x20] sm:$0xff]  ;;  %v1357_v53 = vld [vmem:[#allocation9 + $0x30] sm:$0xff] }
 0x82f   :  { %2825 = vmatpush1.bf16.msra.mxu1 %v2824_v55  ;;  %v1362_v55 = vld [vmem:[#allocation9 + $0x58] sm:$0xff] }
 0x830   :  { %2827 = vmatprep.subr.bf16.mxu1 %v2826_v56  ;;  %v2740_v56 = vpack.c.bf16 %v1357_v53, %v1355_v60  ;;  %v2742_v61 = vpack.c.bf16 %v1362_v55, %v1360_v54  ;;  %v1379_v54 = vld [vmem:[#allocation9 + $0xe0] sm:$0xff]  ;;  %v1381_v55 = vld [vmem:[#allocation9 + $0xf0] sm:$0xff] }
 0x833   :  { %2829 = vmatpush1.bf16.msra.mxu1 %v2828_v63 }
 0x834   :  { %2831 = vmatprep.subr.bf16.mxu1 %v2830_v2  ;;  %v1364_v2 = vld [vmem:[#allocation9 + $0x68] sm:$0xff] }
 0x837   :  { %2833 = vmatpush1.bf16.msra.mxu1 %v2832_v29  ;;  %v2746_v29 = vpack.c.bf16 %v1366_v7, %v1364_v2  ;;  %v1390_v2 = vld [vmem:[#allocation9 + $0x138] sm:$0xff] }
 0x838   :  { %2835 = vmatprep.subr.bf16.mxu1 %v2834_v32  ;;  %v1365_v32 = vld [vmem:[#allocation9 + $0x70] sm:$0xff] }
 0x83b   :  { %2837 = vmatpush1.bf16.msra.mxu1 %v2836_v36 }
 0x83c   :  { %2839 = vmatprep.subr.bf16.mxu1 %v2838_v37 }
 0x83f   :  { %2841 = vmatpush1.bf16.msra.mxu1 %v2840_v6  ;;  %v1374_v6 = vld [vmem:[#allocation9 + $0xb8] sm:$0xff] }
 0x840   :  { %2843 = vmatprep.subr.bf16.mxu1 %v2842_v9 }
 0x897   :  { %v1096_v10 = vpop.xlane.xlu0 %1095 }
 0x898   :  { %3003 = vrcp.f32 %v1096_v10  ;;  %v1099_v11 = vpop.xlane.xlu1 %1098 }
 0x899   :  { %3005 = vrcp.f32 %v1099_v11  ;;  %v2754_v11 = vpack.c.bf16 %v1374_v6, %v1372_v3  ;;  %v1574_v3 = vld [vmem:[#allocation7 + $0x170] sm:$0xff] }
 0x89b   :  { %v1102_v12 = vpop.xlane.xlu0 %1101 }
 0x89c   :  { %3007 = vrcp.f32 %v1102_v12  ;;  %v1105_v15 = vpop.xlane.xlu1 %1104  ;;  %v1371_v12 = vld [vmem:[#allocation9 + $0xa0] sm:$0xff] }
 0x89d   :  { %3009 = vrcp.f32 %v1105_v15 }
 0x89f   :  { %v1108_v51 = vpop.xlane.xlu0 %1107 }
 0x8a0   :  { %3011 = vrcp.f32 %v1108_v51  ;;  %v1111_v57 = vpop.xlane.xlu1 %1110  ;;  %v1380_v51 = vld [vmem:[#allocation9 + $0xe8] sm:$0xff] }
 0x8a1   :  { %3013 = vrcp.f32 %v1111_v57  ;;  %v1386_v57 = vld [vmem:[#allocation9 + $0x118] sm:$0xff] }
 0x8a2   :  { %v3004_v40 = vpop.eup %3003 }
 0x8a3   :  { %v1119_v46 = vmul.f32 %v3004_v40, %v3684_v13  ;;  %v3006_v59 = vpop.eup %3005  ;;  %v1359_v13 = vld [vmem:[#allocation9 + $0x40] sm:$0xff]  ;;  %v1114_v27 = vpop.xlane.xlu0 %1113  ;;  %v2758_v40 = vpack.c.bf16 %v1378_v18, %v1376_v16  ;;  %v1401_v16 = vld [vmem:[#allocation9 + $0x190] sm:$0xff] }
 0x8a4   :  { %v1121_v58 = vmul.f32 %v3006_v59, %v3686_v17  ;;  %v2744_v8 = vpack.c.bf16 %v1361_v62, %v1359_v13  ;;  %v1363_v17 = vld [vmem:[#allocation9 + $0x60] sm:$0xff]  ;;  %3015 = vrcp.f32 %v1114_v27  ;;  %v1117_v36 = vpop.xlane.xlu1 %1116 }
 0x8a5   :  { %2498 = vmatmul.mubr.msk.f32.vlgmr.msra.gmra.mrb[24].mxu0 %vm1045_vm13, %v1119_v46  ;;  %v2748_v35 = vpack.c.bf16 %v1365_v32, %v1363_v17  ;;  %3017 = vrcp.f32 %v1117_v36  ;;  %v1377_v46 = vld [vmem:[#allocation9 + $0xd0] sm:$0xff]  ;;  %v1383_v62 = vld [vmem:[#allocation9 + $0x100] sm:$0xff]  ;;  %v1394_v17 = vld [vmem:[#allocation9 + $0x158] sm:$0xff] }
 0x8a6   :  { %1228 = vmatprep.mubr.f32.mxu0 %v3240_v5  ;;  %2737 = vmatpush1.bf16.msra.mxu0 %v2736_v43  ;;  %v3008_v63 = vpop.eup %3007  ;;  %v1375_v43 = vld [vmem:[#allocation9 + $0xc0] sm:$0xff] }
 0x8a7   :  { %2739 = vmatprep.subr.bf16.mxu0 %v2738_v52  ;;  %v1123_v28 = vmul.f32 %v3008_v63, %v3692_v20  ;;  %v3010_v33 = vpop.eup %3009  ;;  %v1367_v20 = vld [vmem:[#allocation9 + $0x80] sm:$0xff]  ;;  %v1382_v52 = vld [vmem:[#allocation9 + $0xf8] sm:$0xff]  ;;  %v2760_v60 = vpack.c.bf16 %v1377_v46, %v1375_v43  ;;  %v1385_v63 = vld [vmem:[#allocation9 + $0x110] sm:$0xff] }
 0x8a8   :  { %v1125_v37 = vmul.f32 %v3010_v33, %v3694_v22  ;;  %v2752_v9 = vpack.c.bf16 %v1369_v39, %v1367_v20  ;;  %v1373_v22 = vld [vmem:[#allocation9 + $0xb0] sm:$0xff]  ;;  %v2762_v59 = vpack.c.bf16 %v1382_v52, %v1380_v51  ;;  %v2768_v7 = vpack.c.bf16 %v1385_v63, %v1383_v62  ;;  %v1387_v27 = vld [vmem:[#allocation9 + $0x120] sm:$0xff]  ;;  %v1404_v46 = vld [vmem:[#allocation9 + $0x1a8] sm:$0xff] }
 0x8a9   :  { %2499 = vmatmul.mubr.msk.f32.gmra.mrb[26].mxu0 %vm1045_vm13, %v1121_v58  ;;  %v2756_v19 = vpack.c.bf16 %v1373_v22, %v1371_v12  ;;  %v2764_v58 = vpack.c.bf16 %v1381_v55, %v1379_v54  ;;  %v1391_v33 = vld [vmem:[#allocation9 + $0x140] sm:$0xff]  ;;  %v1397_v20 = vld [vmem:[#allocation9 + $0x170] sm:$0xff]  ;;  %v1579_v22 = vld [vmem:[#allocation7 + $0x198] sm:$0xff] }
 0x8aa   :  { %1234 = vmatprep.mubr.f32.mxu0 %v3240_v5  ;;  %2741 = vmatpush1.bf16.msra.mxu0 %v2740_v56  ;;  %v3012_v0 = vpop.eup %3011  ;;  %v1384_v56 = vld [vmem:[#allocation9 + $0x108] sm:$0xff]  ;;  %v2776_v36 = vpack.c.bf16 %v1393_v26, %v1391_v33  ;;  %v1572_v39 = vld [vmem:[#allocation7 + $0x160] sm:$0xff]  ;;  %v1587_v63 = vld [vmem:[#allocation7 + $0x1d8] sm:$0xff] }
 0x8ab   :  { %2743 = vmatprep.subr.bf16.mxu0 %v2742_v61  ;;  %v1127_v10 = vmul.f32 %v3012_v0, %v3700_v41  ;;  %v3014_v15 = vpop.eup %3013  ;;  %v2766_v13 = vpack.c.bf16 %v1386_v57, %v1384_v56  ;;  %v2844_v6 = vpack.c.bf16 %v1574_v3, %v1572_v39  ;;  %v1581_v51 = vld [vmem:[#allocation7 + $0x1a8] sm:$0xff]  ;;  %v1582_v56 = vld [vmem:[#allocation7 + $0x1b0] sm:$0xff]  ;;  %v1591_v33 = vld [vmem:[#allocation7 + $0x1f8] sm:$0xff] }
 0x8ac   :  { %v1129_v25 = vmul.f32 %v3014_v15, %v3702_v42  ;;  %v1399_v15 = vld [vmem:[#allocation9 + $0x180] sm:$0xff] }
 0x8ad   :  { %2500 = vmatmul.mubr.msk.f32.gmra.mrb[28].mxu0 %vm1045_vm13, %v1123_v28  ;;  %v1389_v28 = vld [vmem:[#allocation9 + $0x130] sm:$0xff]  ;;  %2845 = vmatpush1.bf16.msra.mxu1 %v2844_v6 }
 0x8ae   :  { %1240 = vmatprep.mubr.f32.mxu0 %v3240_v5  ;;  %2745 = vmatpush1.bf16.msra.mxu0 %v2744_v8  ;;  %v3016_v41 = vpop.eup %3015  ;;  %v2772_v32 = vpack.c.bf16 %v1389_v28, %v1387_v27  ;;  %v1584_v27 = vld [vmem:[#allocation7 + $0x1c0] sm:$0xff]  ;;  %v1586_v28 = vld [vmem:[#allocation7 + $0x1d0] sm:$0xff] }
 0x8af   :  { %2747 = vmatprep.subr.bf16.mxu0 %v2746_v29  ;;  %v1131_v53 = vmul.f32 %v3016_v41, %v3708_v49  ;;  %v3018_v42 = vpop.eup %3017  ;;  %v1388_v49 = vld [vmem:[#allocation9 + $0x128] sm:$0xff]  ;;  %v1406_v41 = vld [vmem:[#allocation9 + $0x1b8] sm:$0xff] }
 0x8b0   :  { %v1133_v61 = vmul.f32 %v3018_v42, %v3710_v50  ;;  %v2770_v8 = vpack.c.bf16 %v1390_v2, %v1388_v49  ;;  %v1392_v29 = vld [vmem:[#allocation9 + $0x148] sm:$0xff]  ;;  %v2786_v52 = vpack.c.bf16 %v1406_v41, %v1404_v46  ;;  %v1580_v42 = vld [vmem:[#allocation7 + $0x1a0] sm:$0xff]  ;;  %v1409_v2 = vld [vmem:[#allocation9 + $0x1d0] sm:$0xff] }
 0x8b1   :  { %2501 = vmatmul.mubr.msk.f32.gmra.mrb[30].mxu0 %vm1045_vm13, %v1125_v37  ;;  %v2774_v50 = vpack.c.bf16 %v1394_v17, %v1392_v29  ;;  %v2852_v57 = vpack.c.bf16 %v1582_v56, %v1580_v42  ;;  %v1407_v49 = vld [vmem:[#allocation9 + $0x1c0] sm:$0xff]  ;;  %v1412_v29 = vld [vmem:[#allocation9 + $0x1e8] sm:$0xff]  ;;  %v2856_v17 = vpack.c.bf16 %v1586_v28, %v1584_v27 }
 0x8b2   :  { %1246 = vmatprep.mubr.f32.mxu0 %v3240_v5  ;;  %2749 = vmatpush1.bf16.msra.mxu0 %v2748_v35  ;;  %v1398_v35 = vld [vmem:[#allocation9 + $0x178] sm:$0xff] }
 0x8b3   :  { %2751 = vmatprep.subr.bf16.mxu0 %v2750_v38  ;;  %v2778_v37 = vpack.c.bf16 %v1398_v35, %v1396_v34  ;;  %v1395_v38 = vld [vmem:[#allocation9 + $0x160] sm:$0xff] }
 0x8b4   :  { %v2780_v0 = vpack.c.bf16 %v1397_v20, %v1395_v38  ;;  %v1411_v35 = vld [vmem:[#allocation9 + $0x1e0] sm:$0xff]  ;;  %v1590_v20 = vld [vmem:[#allocation7 + $0x1f0] sm:$0xff] }
 0x8b5   :  { %2502 = vmatmul.mubr.msk.f32.gmra.mrb[32].mxu0 %vm1045_vm13, %v1127_v10  ;;  %v1402_v10 = vld [vmem:[#allocation9 + $0x198] sm:$0xff] }
 0x8b6   :  { %1252 = vmatprep.mubr.f32.mxu0 %v3240_v5  ;;  %2753 = vmatpush1.bf16.msra.mxu0 %v2752_v9  ;;  %v1400_v9 = vld [vmem:[#allocation9 + $0x188] sm:$0xff] }
 0x8b7   :  { %2755 = vmatprep.subr.bf16.mxu0 %v2754_v11  ;;  %v1577_v11 = vld [vmem:[#allocation7 + $0x188] sm:$0xff]  ;;  %v2782_v12 = vpack.c.bf16 %v1402_v10, %v1400_v9 }
 0x8b8   :  { %v2846_v18 = vpack.c.bf16 %v1579_v22, %v1577_v11 }
 0x8b9   :  { %2503 = vmatmul.mubr.msk.f32.gmra.mrb[34].mxu0 %vm1045_vm13, %v1129_v25  ;;  %v1576_v25 = vld [vmem:[#allocation7 + $0x180] sm:$0xff] }
 0x8ba   :  { %1258 = vmatprep.mubr.f32.mxu0 %v3240_v5  ;;  %2757 = vmatpush1.bf16.msra.mxu0 %v2756_v19  ;;  %v2784_v19 = vpack.c.bf16 %v1401_v16, %v1399_v15 }
 0x8bb   :  { %2759 = vmatprep.subr.bf16.mxu0 %v2758_v40  ;;  %v1578_v40 = vld [vmem:[#allocation7 + $0x190] sm:$0xff]  ;;  %2847 = vmatprep.subr.bf16.mxu1 %v2846_v18 }
 0x8bc   :  { %v2848_v43 = vpack.c.bf16 %v1578_v40, %v1576_v25 }
 0x8bd   :  { %2504 = vmatmul.mubr.msk.f32.gmra.mrb[36].mxu0 %vm1045_vm13, %v1131_v53  ;;  %v1403_v53 = vld [vmem:[#allocation9 + $0x1a0] sm:$0xff] }
 0x8be   :  { %1264 = vmatprep.mubr.f32.mxu0 %v3240_v5  ;;  %2761 = vmatpush1.bf16.msra.mxu0 %v2760_v60  ;;  %v1583_v60 = vld [vmem:[#allocation7 + $0x1b8] sm:$0xff] }
 0x8bf   :  { %2763 = vmatprep.subr.bf16.mxu0 %v2762_v59  ;;  %2849 = vmatpush1.bf16.msra.mxu1 %v2848_v43  ;;  %v1405_v59 = vld [vmem:[#allocation9 + $0x1b0] sm:$0xff]  ;;  %v2850_v54 = vpack.c.bf16 %v1583_v60, %v1581_v51 }
 0x8c0   :  { %v2788_v55 = vpack.c.bf16 %v1405_v59, %v1403_v53 }
 0x8c1   :  { %2505 = vmatmul.mubr.msk.f32.gmra.mrb[38].mxu0 %vm1045_vm13, %v1133_v61  ;;  %2851 = vmatprep.subr.bf16.mxu1 %v2850_v54  ;;  %v1410_v61 = vld [vmem:[#allocation9 + $0x1d8] sm:$0xff] }
 0x8c2   :  { %2765 = vmatpush1.bf16.msra.mxu0 %v2764_v58  ;;  %v1408_v58 = vld [vmem:[#allocation9 + $0x1c8] sm:$0xff] }
 0x8c3   :  { %2767 = vmatprep.subr.bf16.mxu0 %v2766_v13  ;;  %v1585_v13 = vld [vmem:[#allocation7 + $0x1c8] sm:$0xff]  ;;  %2853 = vmatpush1.bf16.msra.mxu1 %v2852_v57  ;;  %v2790_v62 = vpack.c.bf16 %v1410_v61, %v1408_v58 }
 0x8c6   :  { %2769 = vmatpush1.bf16.msra.mxu0 %v2768_v7  ;;  %v2854_v7 = vpack.c.bf16 %v1587_v63, %v1585_v13 }
 0x8c7   :  { %2771 = vmatprep.subr.bf16.mxu0 %v2770_v8  ;;  %v2792_v8 = vpack.c.bf16 %v1409_v2, %v1407_v49 }
 0x8c8   :  { %2855 = vmatprep.subr.bf16.mxu1 %v2854_v7 }
 0x8c9   :  { %2857 = vmatpush1.bf16.msra.mxu1 %v2856_v17 }
 0x8ca   :  { %2773 = vmatpush1.bf16.msra.mxu0 %v2772_v32  ;;  %v1414_v32 = vld [vmem:[#allocation9 + $0x1f8] sm:$0xff] }
 0x8cb   :  { %2775 = vmatprep.subr.bf16.mxu0 %v2774_v50  ;;  %v1589_v50 = vld [vmem:[#allocation7 + $0x1e8] sm:$0xff]  ;;  %v2794_v26 = vpack.c.bf16 %v1414_v32, %v1412_v29 }
 0x8cc   :  { %v2858_v34 = vpack.c.bf16 %v1591_v33, %v1589_v50 }
 0x8ce   :  { %2777 = vmatpush1.bf16.msra.mxu0 %v2776_v36  ;;  %v1413_v36 = vld [vmem:[#allocation9 + $0x1f0] sm:$0xff]  ;;  %2859 = vmatprep.subr.bf16.mxu1 %v2858_v34 }
 0x8cf   :  { %2779 = vmatprep.subr.bf16.mxu0 %v2778_v37  ;;  %v1588_v37 = vld [vmem:[#allocation7 + $0x1e0] sm:$0xff]  ;;  %v2796_v38 = vpack.c.bf16 %v1413_v36, %v1411_v35 }
 0x8d0   :  { %v2860_v39 = vpack.c.bf16 %v1590_v20, %v1588_v37 }
 0x8d2   :  { %2781 = vmatpush1.bf16.msra.mxu0 %v2780_v0  ;;  %2861 = vmatpush1.bf16.msra.mxu1 %v2860_v39 }
 0x8d3   :  { %2783 = vmatprep.subr.bf16.mxu0 %v2782_v12 }
 0x8d6   :  { %2785 = vmatpush1.bf16.msra.mxu0 %v2784_v19 }
 0x8d7   :  { %2787 = vmatprep.subr.bf16.mxu0 %v2786_v52 }
 0x8da   :  { %2789 = vmatpush1.bf16.msra.mxu0 %v2788_v55 }
 0x8db   :  { %2791 = vmatprep.subr.bf16.mxu0 %v2790_v62 }
 0x8de   :  { %2793 = vmatpush1.bf16.msra.mxu0 %v2792_v8 }
 0x8df   :  { %2795 = vmatprep.subr.bf16.mxu0 %v2794_v26 }
 0x8e2   :  { %2797 = vmatpush1.bf16.msra.mxu0 %v2796_v38 }
 0x978   :  { %v1224_v0 = vpop.f32.mrb[24].mxu0 }
 0x979   :  { %v1287_v3 = vmul.f32 1.442695, %v1224_v0  ;;  %v1226_v6 = vpop.f32.mrb[25].mxu0  ;;  %vm1271_vm6 = vcmp.gt.f32.partialorder %v1224_v0, 0.0 }
 0x97a   :  { %v1289_v9 = vmul.f32 1.442695, %v1226_v6  ;;  %vm1272_vm5 = vcmp.gt.f32.partialorder %v1226_v6, 0.0 }
 0x97b   :  { %3019 = vpow2.f32 %v1287_v3 }
 0x97c   :  { %3021 = vpow2.f32 %v1289_v9  ;;  %v1230_v10 = vpop.f32.mrb[26].mxu0 }
 0x97d   :  { %v1291_v11 = vmul.f32 1.442695, %v1230_v10  ;;  %v1232_v12 = vpop.f32.mrb[27].mxu0  ;;  %vm1273_vm2 = vcmp.gt.f32.partialorder %v1230_v10, 0.0 }
 0x97e   :  { %v1293_v22 = vmul.f32 1.442695, %v1232_v12  ;;  %vm1274_vm1 = vcmp.gt.f32.partialorder %v1232_v12, 0.0 }
 0x97f   :  { %3023 = vpow2.f32 %v1291_v11 }
 0x980   :  { %3025 = vpow2.f32 %v1293_v22  ;;  %v3742_v15 = vpop.f32.mrb[28].mxu0 }
 0x981   :  { %v1295_v16 = vmul.f32 1.442695, %v3742_v15  ;;  %v1238_v18 = vpop.f32.mrb[29].mxu0 }
 0x982   :  { %v1297_v19 = vmul.f32 1.442695, %v1238_v18 }
 0x983   :  { %3027 = vpow2.f32 %v1295_v16 }
 0x984   :  { %3029 = vpow2.f32 %v1297_v19  ;;  %v3745_v25 = vpop.f32.mrb[30].mxu0 }
 0x985   :  { %v3020_v40 = vpop.eup %3019  ;;  %v1299_v43 = vmul.f32 1.442695, %v3745_v25  ;;  %v3748_v46 = vpop.f32.mrb[31].mxu0 }
 0x986   :  { %v3022_v41 = vpop.eup %3021  ;;  %v2506_v51 = vadd.f32 -1.0, %v3020_v40  ;;  %v1301_v52 = vmul.f32 1.442695, %v3748_v46 }
 0x987   :  { %3031 = vpow2.f32 %v1299_v43  ;;  %v2507_v60 = vadd.f32 -1.0, %v3022_v41 }
 0x988   :  { %3033 = vpow2.f32 %v1301_v52  ;;  %v3751_v53 = vpop.f32.mrb[32].mxu0  ;;  %v1335_v57 = vsel %vm1271_vm6, %v1224_v0, %v2506_v51  ;;  %vm1275_vm6 = vcmp.gt.f32.partialorder %v3742_v15, 0.0 }
 0x989   :  { %v3024_v59 = vpop.eup %3023  ;;  %v1303_v54 = vmul.f32 1.442695, %v3751_v53  ;;  %v3754_v55 = vpop.f32.mrb[33].mxu0  ;;  %v1336_v42 = vsel %vm1272_vm5, %v1226_v6, %v2507_v60  ;;  %vm1276_vm5 = vcmp.gt.f32.partialorder %v1238_v18, 0.0 }
 0x98a   :  { %v3026_v56 = vpop.eup %3025  ;;  %v1305_v58 = vmul.f32 1.442695, %v3754_v55  ;;  %1479 = vmatprep.mubr.f32.mxu0 %v1336_v42  ;;  %1656 = vmatprep.mubr.f32.mxu1 %v1336_v42  ;;  %v2508_v61 = vadd.f32 -1.0, %v3024_v59 }
 0x98b   :  { %3035 = vpow2.f32 %v1303_v54  ;;  %1480 = vmatmul.mubr.f32.vlgmr.msra.gmra.mrb[40].mxu0 %v1335_v57  ;;  %1657 = vmatmul.mubr.f32.vlgmr.msra.gmra.mrb[20].mxu1 %v1335_v57  ;;  %v2509_v13 = vadd.f32 -1.0, %v3026_v56 }
 0x98c   :  { %3037 = vpow2.f32 %v1305_v58  ;;  %v3757_v62 = vpop.f32.mrb[34].mxu0  ;;  %v1337_v28 = vsel %vm1273_vm2, %v1230_v10, %v2508_v61  ;;  %vm1277_vm2 = vcmp.gt.f32.partialorder %v3745_v25, 0.0 }
 0x98d   :  { %v3028_v63 = vpop.eup %3027  ;;  %v1307_v49 = vmul.f32 1.442695, %v3757_v62  ;;  %v3760_v2 = vpop.f32.mrb[35].mxu0  ;;  %v1338_v7 = vsel %vm1274_vm1, %v1232_v12, %v2509_v13  ;;  %vm1278_vm1 = vcmp.gt.f32.partialorder %v3748_v46, 0.0 }
 0x98e   :  { %v3030_v8 = vpop.eup %3029  ;;  %v1309_v27 = vmul.f32 1.442695, %v3760_v2  ;;  %1485 = vmatprep.mubr.f32.mxu0 %v1338_v7  ;;  %1662 = vmatprep.mubr.f32.mxu1 %v1338_v7  ;;  %v2510_v29 = vadd.f32 -1.0, %v3028_v63  ;;  %v3785_v13 = vld [vmem:[%s3985_s10] ss:$8 sm:$0x3] }
 0x98f   :  { %3039 = vpow2.f32 %v1307_v49  ;;  %1486 = vmatmul.mubr.f32.gmra.mrb[42].mxu0 %v1337_v28  ;;  %1663 = vmatmul.mubr.f32.gmra.mrb[22].mxu1 %v1337_v28  ;;  %v2511_v17 = vadd.f32 -1.0, %v3030_v8  ;;  %v2522_v63 = vld [vmem:[%s3985_s10 + $0x1] ss:$8 sm:$0x3] }
 0x990   :  { %3041 = vpow2.f32 %v1309_v27  ;;  %v3763_v32 = vpop.f32.mrb[36].mxu0  ;;  %v1339_v37 = vsel %vm1275_vm6, %v3742_v15, %v2510_v29  ;;  %vm1279_vm6 = vcmp.gt.f32.partialorder %v3751_v53, 0.0  ;;  %v3793_v49 = vrot.slane %v2522_v63, %v3523_v4 }
 0x991   :  { %v3032_v50 = vpop.eup %3031  ;;  %v1311_v33 = vmul.f32 1.442695, %v3763_v32  ;;  %v1262_v26 = vpop.f32.mrb[37].mxu0  ;;  %v1340_v34 = vsel %vm1276_vm5, %v1238_v18, %v2511_v17  ;;  %vm1280_vm5 = vcmp.gt.f32.partialorder %v3754_v55, 0.0 }
 0x992   :  { %v3034_v35 = vpop.eup %3033  ;;  %v1313_v36 = vmul.f32 1.442695, %v1262_v26  ;;  %1491 = vmatprep.mubr.f32.mxu0 %v1340_v34  ;;  %1668 = vmatprep.mubr.f32.mxu1 %v1340_v34  ;;  %v2512_v38 = vadd.f32 -1.0, %v3032_v50 }
 0x993   :  { %3043 = vpow2.f32 %v1311_v33  ;;  %1492 = vmatmul.mubr.f32.gmra.mrb[44].mxu0 %v1339_v37  ;;  %1669 = vmatmul.mubr.f32.gmra.mrb[24].mxu1 %v1339_v37  ;;  %v2513_v20 = vadd.f32 -1.0, %v3034_v35 }
 0x994   :  { %3045 = vpow2.f32 %v1313_v36  ;;  %v1266_v39 = vpop.f32.mrb[38].mxu0  ;;  %v1341_v12 = vsel %vm1277_vm2, %v3745_v25, %v2512_v38  ;;  %vm1281_vm2 = vcmp.gt.f32.partialorder %v3757_v62, 0.0 }
 0x995   :  { %v3036_v0 = vpop.eup %3035  ;;  %v1315_v3 = vmul.f32 1.442695, %v1266_v39  ;;  %v1268_v6 = vpop.f32.mrb[39].mxu0  ;;  %v1342_v9 = vsel %vm1278_vm1, %v3748_v46, %v2513_v20  ;;  %vm1282_vm1 = vcmp.gt.f32.partialorder %v3760_v2, 0.0 }
 0x996   :  { %v3038_v10 = vpop.eup %3037  ;;  %v1317_v11 = vmul.f32 1.442695, %v1268_v6  ;;  %1497 = vmatprep.mubr.f32.mxu0 %v1342_v9  ;;  %1674 = vmatprep.mubr.f32.mxu1 %v1342_v9  ;;  %v2514_v22 = vadd.f32 -1.0, %v3036_v0 }
 0x997   :  { %3047 = vpow2.f32 %v1315_v3  ;;  %1498 = vmatmul.mubr.f32.gmra.mrb[46].mxu0 %v1341_v12  ;;  %1675 = vmatmul.mubr.f32.gmra.mrb[26].mxu1 %v1341_v12  ;;  %v2515_v15 = vadd.f32 -1.0, %v3038_v10 }
 0x998   :  { %3049 = vpow2.f32 %v1317_v11  ;;  %v1343_v40 = vsel %vm1279_vm6, %v3751_v53, %v2514_v22  ;;  %vm1283_vm6 = vcmp.gt.f32.partialorder %v3763_v32, 0.0 }
 0x999   :  { %v3040_v16 = vpop.eup %3039  ;;  %v1344_v18 = vsel %vm1280_vm5, %v3754_v55, %v2515_v15  ;;  %vm1284_vm5 = vcmp.gt.f32.partialorder %v1262_v26, 0.0 }
 0x99a   :  { %v3042_v19 = vpop.eup %3041  ;;  %1503 = vmatprep.mubr.f32.mxu0 %v1344_v18  ;;  %1680 = vmatprep.mubr.f32.mxu1 %v1344_v18  ;;  %v2516_v43 = vadd.f32 -1.0, %v3040_v16 }
 0x99b   :  { %1504 = vmatmul.mubr.f32.gmra.mrb[48].mxu0 %v1343_v40  ;;  %1681 = vmatmul.mubr.f32.gmra.mrb[28].mxu1 %v1343_v40  ;;  %v2517_v25 = vadd.f32 -1.0, %v3042_v19 }
 0x99c   :  { %v1345_v52 = vsel %vm1281_vm2, %v3757_v62, %v2516_v43  ;;  %vm1285_vm2 = vcmp.gt.f32.partialorder %v1266_v39, 0.0  ;;  %v1719_v62 = vrot.slane %v3785_v13, %v3514_v1 }
 0x99d   :  { %v3044_v46 = vpop.eup %3043  ;;  %v1346_v41 = vsel %vm1282_vm1, %v3760_v2, %v2517_v25  ;;  %vm1286_vm1 = vcmp.gt.f32.partialorder %v1268_v6, 0.0  ;;  %v3796_v2 = vrot.slane %v2522_v63, %v3514_v1 }
 0x99e   :  { %v3046_v51 = vpop.eup %3045  ;;  %1509 = vmatprep.mubr.f32.mxu0 %v1346_v41  ;;  %1686 = vmatprep.mubr.f32.mxu1 %v1346_v41  ;;  %v2518_v60 = vadd.f32 -1.0, %v3044_v46 }
 0x99f   :  { %1510 = vmatmul.mubr.f32.gmra.mrb[50].mxu0 %v1345_v52  ;;  %1687 = vmatmul.mubr.f32.gmra.mrb[30].mxu1 %v1345_v52  ;;  %v2519_v53 = vadd.f32 -1.0, %v3046_v51 }
 0x9a0   :  { %v1347_v42 = vsel %vm1283_vm6, %v3763_v32, %v2518_v60 }
 0x9a1   :  { %v3048_v59 = vpop.eup %3047  ;;  %v1348_v54 = vsel %vm1284_vm5, %v1262_v26, %v2519_v53 }
 0x9a2   :  { %v3050_v55 = vpop.eup %3049  ;;  %1515 = vmatprep.mubr.f32.mxu0 %v1348_v54  ;;  %1692 = vmatprep.mubr.f32.mxu1 %v1348_v54  ;;  %v2520_v56 = vadd.f32 -1.0, %v3048_v59 }
 0x9a3   :  { %1516 = vmatmul.mubr.f32.gmra.mrb[52].mxu0 %v1347_v42  ;;  %1693 = vmatmul.mubr.f32.gmra.mrb[32].mxu1 %v1347_v42  ;;  %v2521_v57 = vadd.f32 -1.0, %v3050_v55 }
 0x9a4   :  { %v1349_v61 = vsel %vm1285_vm2, %v1266_v39, %v2520_v56 }
 0x9a5   :  { %v1350_v58 = vsel %vm1286_vm1, %v1268_v6, %v2521_v57 }
 0x9a6   :  { %1521 = vmatprep.mubr.f32.mxu0 %v1350_v58  ;;  %1698 = vmatprep.mubr.f32.mxu1 %v1350_v58 }
 0x9a7   :  { %1522 = vmatmul.mubr.f32.gmra.mrb[54].mxu0 %v1349_v61  ;;  %1699 = vmatmul.mubr.f32.gmra.mrb[34].mxu1 %v1349_v61 }
 0x9a8   :  { %1786 = vmatprep.mubr.f32.mxu0 %v1719_v62 }
 0xa5e   :  { %v1481_v7 = vpop.f32.mrb[40].mxu0  ;;  %v3798_v8 = vpop.f32.mrb[20].mxu1 }
 0xa5f   :  { %v2064_v27 = vmul.f32 %v3793_v49, %v1481_v7  ;;  %v1483_v28 = vpop.f32.mrb[41].mxu0  ;;  %v3801_v29 = vpop.f32.mrb[21].mxu1 }
 0xa60   :  { %v2065_v17 = vmul.f32 %v3796_v2, %v1483_v28 }
 0xa62   :  { %v1487_v32 = vpop.f32.mrb[42].mxu0  ;;  %v3804_v50 = vpop.f32.mrb[22].mxu1  ;;  %v3806_v33 = vadd.f32 %v2065_v17, %v2064_v27 }
 0xa63   :  { %v2864_v26 = vpack.c.bf16 %v1487_v32, %v1481_v7  ;;  %v2066_v34 = vmul.f32 %v3793_v49, %v1487_v32  ;;  %v2880_v35 = vpack.c.bf16 %v3804_v50, %v3798_v8  ;;  %v1489_v36 = vpop.f32.mrb[43].mxu0  ;;  %v3811_v37 = vpop.f32.mrb[23].mxu1 }
 0xa64   :  { %v2862_v38 = vpack.c.bf16 %v1489_v36, %v1483_v28  ;;  %v2067_v20 = vmul.f32 %v3796_v2, %v1489_v36  ;;  %v2878_v39 = vpack.c.bf16 %v3811_v37, %v3801_v29 }
 0xa66   :  { %v1493_v0 = vpop.f32.mrb[44].mxu0  ;;  %v3816_v3 = vpop.f32.mrb[24].mxu1  ;;  %2863 = vmatprep.subr.bf16.mxu0 %v2862_v38  ;;  %v3818_v6 = vadd.f32 %v2067_v20, %v2066_v34 }
 0xa67   :  { %v2068_v9 = vmul.f32 %v3793_v49, %v1493_v0  ;;  %v1495_v10 = vpop.f32.mrb[45].mxu0  ;;  %v3821_v11 = vpop.f32.mrb[25].mxu1  ;;  %2865 = vmatpush1.bf16.xpose.msra.mxu0 %v2864_v26 }
 0xa68   :  { %v2069_v12 = vmul.f32 %v3796_v2, %v1495_v10 }
 0xa6a   :  { %v1499_v22 = vpop.f32.mrb[46].mxu0  ;;  %v1676_v15 = vpop.f32.mrb[26].mxu1  ;;  %v2086_v16 = vadd.f32 %v2069_v12, %v2068_v9 }
 0xa6b   :  { %v2868_v18 = vpack.c.bf16 %v1499_v22, %v1493_v0  ;;  %v2070_v19 = vmul.f32 %v3793_v49, %v1499_v22  ;;  %v2884_v40 = vpack.c.bf16 %v1676_v15, %v3816_v3  ;;  %v1501_v43 = vpop.f32.mrb[47].mxu0  ;;  %v1678_v25 = vpop.f32.mrb[27].mxu1 }
 0xa6c   :  { %v2866_v46 = vpack.c.bf16 %v1501_v43, %v1495_v10  ;;  %v2071_v41 = vmul.f32 %v3796_v2, %v1501_v43  ;;  %v2882_v51 = vpack.c.bf16 %v1678_v25, %v3821_v11  ;;  %2087 = vadd.xlane.f32.xlu0 %v2086_v16 }
 0xa6e   :  { %v1505_v52 = vpop.f32.mrb[48].mxu0  ;;  %v1682_v60 = vpop.f32.mrb[28].mxu1  ;;  %2867 = vmatprep.subr.bf16.mxu0 %v2866_v46  ;;  %v3828_v53 = vadd.f32 %v2071_v41, %v2070_v19  ;;  %v1715_v41 = vrot.slane %v3785_v13, %v3523_v4 }
 0xa6f   :  { %v2072_v59 = vmul.f32 %v3793_v49, %v1505_v52  ;;  %v1507_v54 = vpop.f32.mrb[49].mxu0  ;;  %v1684_v55 = vpop.f32.mrb[29].mxu1  ;;  %2869 = vmatpush1.bf16.xpose.msra.mxu0 %v2868_v18 }
 0xa70   :  { %v2073_v42 = vmul.f32 %v3796_v2, %v1507_v54 }
 0xa72   :  { %v1511_v56 = vpop.f32.mrb[50].mxu0  ;;  %v1688_v57 = vpop.f32.mrb[30].mxu1  ;;  %v3832_v58 = vadd.f32 %v2073_v42, %v2072_v59 }
 0xa73   :  { %v2872_v61 = vpack.c.bf16 %v1511_v56, %v1505_v52  ;;  %v2074_v62 = vmul.f32 %v3793_v49, %v1511_v56  ;;  %v2888_v63 = vpack.c.bf16 %v1688_v57, %v1682_v60  ;;  %v1513_v7 = vpop.f32.mrb[51].mxu0  ;;  %v1690_v27 = vpop.f32.mrb[31].mxu1 }
 0xa74   :  { %v2870_v28 = vpack.c.bf16 %v1513_v7, %v1507_v54  ;;  %v2075_v17 = vmul.f32 %v3796_v2, %v1513_v7  ;;  %v2886_v32 = vpack.c.bf16 %v1690_v27, %v1684_v55  ;;  %v1914_v27 = vld [vmem:[#allocation10 + $0x10] sm:$0xff] }
 0xa76   :  { %v1517_v26 = vpop.f32.mrb[52].mxu0  ;;  %v1694_v34 = vpop.f32.mrb[32].mxu1  ;;  %2871 = vmatprep.subr.bf16.mxu0 %v2870_v28  ;;  %v2095_v36 = vadd.f32 %v2075_v17, %v2074_v62  ;;  %v1915_v62 = vld [vmem:[#allocation10 + $0x18] sm:$0xff]  ;;  %v1917_v28 = vld [vmem:[#allocation10 + $0x28] sm:$0xff] }
 0xa77   :  { %v2076_v38 = vmul.f32 %v3793_v49, %v1517_v26  ;;  %v1519_v20 = vpop.f32.mrb[53].mxu0  ;;  %v1696_v0 = vpop.f32.mrb[33].mxu1  ;;  %2873 = vmatpush1.bf16.xpose.msra.mxu0 %v2872_v61  ;;  %v1913_v61 = vld [vmem:[#allocation10 + $0x8] sm:$0xff]  ;;  %v1919_v17 = vld [vmem:[#allocation10 + $0x38] sm:$0xff] }
 0xa78   :  { %v2077_v3 = vmul.f32 %v3796_v2, %v1519_v20  ;;  %v2894_v7 = vpack.c.bf16 %v1915_v62, %v1913_v61  ;;  %v1944_v61 = vld [vmem:[#allocation10 + $0x100] sm:$0xff]  ;;  %v1946_v62 = vld [vmem:[#allocation10 + $0x110] sm:$0xff] }
 0xa7a   :  { %v1523_v9 = vpop.f32.mrb[54].mxu0  ;;  %v1700_v10 = vpop.f32.mrb[34].mxu1  ;;  %v2098_v11 = vadd.f32 %v2077_v3, %v2076_v38  ;;  %v1921_v38 = vld [vmem:[#allocation10 + $0x48] sm:$0xff]  ;;  %2895 = vmatprep.subr.bf16.mxu1 %v2894_v7  ;;  %v1927_v3 = vld [vmem:[#allocation10 + $0x78] sm:$0xff] }
 0xa7b   :  { %v2876_v12 = vpack.c.bf16 %v1523_v9, %v1517_v26  ;;  %v2078_v22 = vmul.f32 %v3793_v49, %v1523_v9  ;;  %v2892_v15 = vpack.c.bf16 %v1700_v10, %v1694_v34  ;;  %v1525_v16 = vpop.f32.mrb[55].mxu0  ;;  %v1702_v18 = vpop.f32.mrb[35].mxu1  ;;  %v2898_v26 = vpack.c.bf16 %v1919_v17, %v1917_v28  ;;  %v1916_v34 = vld [vmem:[#allocation10 + $0x20] sm:$0xff]  ;;  %v1951_v7 = vld [vmem:[#allocation10 + $0x138] sm:$0xff] }
 0xa7c   :  { %v2874_v19 = vpack.c.bf16 %v1525_v16, %v1519_v20  ;;  %v2079_v43 = vmul.f32 %v3796_v2, %v1525_v16  ;;  %v2890_v25 = vpack.c.bf16 %v1702_v18, %v1696_v0  ;;  %v1795_v49 = vpop.permute.xlu0 %1794  ;;  %v1922_v20 = vld [vmem:[#allocation10 + $0x50] sm:$0xff]  ;;  %v1925_v0 = vld [vmem:[#allocation10 + $0x68] sm:$0xff]  ;;  %v1948_v17 = vld [vmem:[#allocation10 + $0x120] sm:$0xff] }
 0xa7d   :  { %v2906_v10 = vpack.c.bf16 %v1927_v3, %v1925_v0  ;;  %v1956_v3 = vld [vmem:[#allocation10 + $0x160] sm:$0xff] }
 0xa7e   :  { %2875 = vmatprep.subr.bf16.mxu0 %v2874_v19  ;;  %v2101_v46 = vadd.f32 %v2079_v43, %v2078_v22  ;;  %v1929_v22 = vld [vmem:[#allocation10 + $0x88] sm:$0xff]  ;;  %v1928_v19 = vld [vmem:[#allocation10 + $0x80] sm:$0xff]  ;;  %v1930_v43 = vld [vmem:[#allocation10 + $0x90] sm:$0xff] }
 0xa7f   :  { %2877 = vmatpush1.bf16.xpose.msra.mxu0 %v2876_v12  ;;  %v1926_v12 = vld [vmem:[#allocation10 + $0x70] sm:$0xff] }
 0xa80   :  { %2879 = vmatprep.subr.bf16.mxu0 %v2878_v39 }
 0xa86   :  { %1787 = vmatmul.mubr.f32.vlgmr.msra.gmra.mrb[56].mxu0 %v1715_v41  ;;  %v2912_v41 = vpack.c.bf16 %v1930_v43, %v1928_v19  ;;  %v1967_v19 = vld [vmem:[#allocation10 + $0x1b8] sm:$0xff] }
 0xa87   :  { %2881 = vmatpush1.bf16.msra.mxu0 %v2880_v35  ;;  %1899 = vmatprep.mubr.f32.mxu0 %v3240_v5 }
 0xa88   :  { %2883 = vmatprep.subr.bf16.mxu0 %v2882_v51 }
 0xa8b   :  { %2885 = vmatpush1.bf16.msra.mxu0 %v2884_v40 }
 0xa8c   :  { %2887 = vmatprep.subr.bf16.mxu0 %v2886_v32 }
 0xa8f   :  { %2889 = vmatpush1.bf16.msra.mxu0 %v2888_v63  ;;  %v1912_v63 = vld [vmem:[#allocation10] sm:$0xff] }
 0xa90   :  { %2891 = vmatprep.subr.bf16.mxu0 %v2890_v25  ;;  %v2896_v32 = vpack.c.bf16 %v1914_v27, %v1912_v63  ;;  %v1933_v25 = vld [vmem:[#allocation10 + $0xa8] sm:$0xff]  ;;  %v2928_v27 = vpack.c.bf16 %v1946_v62, %v1944_v61 }
 0xa91   :  { %v1949_v63 = vld [vmem:[#allocation10 + $0x128] sm:$0xff] }
 0xa92   :  { %2897 = vmatpush1.bf16.msra.mxu1 %v2896_v32  ;;  %v2930_v28 = vpack.c.bf16 %v1951_v7, %v1949_v63  ;;  %v1950_v32 = vld [vmem:[#allocation10 + $0x130] sm:$0xff] }
 0xa93   :  { %2893 = vmatpush1.bf16.msra.mxu0 %v2892_v15  ;;  %2899 = vmatprep.subr.bf16.mxu1 %v2898_v26  ;;  %v1931_v15 = vld [vmem:[#allocation10 + $0x98] sm:$0xff]  ;;  %v1953_v26 = vld [vmem:[#allocation10 + $0x148] sm:$0xff] }
 0xa94   :  { %v2910_v18 = vpack.c.bf16 %v1931_v15, %v1929_v22  ;;  %v1960_v15 = vld [vmem:[#allocation10 + $0x180] sm:$0xff] }
 0xb59   :  { %v1788_v2 = vpop.f32.mrb[56].mxu0 }
 0xb5a   :  { %v1797_v29 = vadd.f32 %v1795_v49, %v1788_v2  ;;  %v1790_v37 = vpop.f32.mrb[57].mxu0  ;;  %v1932_v2 = vld [vmem:[#allocation10 + $0xa0] sm:$0xff] }
 0xb5b   :  { %v1937_v37 = vld [vmem:[#allocation10 + $0xc8] sm:$0xff] }
 0xb5c   :  { %vm1798_vm5 = vcmp.gt.f32.partialorder %v1797_v29, 0.0  ;;  %v1799_v39 = vmul.f32 0.2, %v1797_v29 }
 0xb5e   :  { %v1800_v13 = vsel %vm1798_vm5, %v1797_v29, %v1799_v39  ;;  %v1934_v29 = vld [vmem:[#allocation10 + $0xb0] sm:$0xff]  ;;  %v1939_v39 = vld [vmem:[#allocation10 + $0xd8] sm:$0xff] }
 0xb5f   :  { %v1804_v52 = vrot.slane %v1800_v13, %v3523_v4  ;;  %v2916_v13 = vpack.c.bf16 %v1934_v29, %v1932_v2  ;;  %v1971_v2 = vld [vmem:[#allocation10 + $0x1d8] sm:$0xff] }
 0xb61   :  { %v1805_v8 = vsel %vm122_vm10, %v1804_v52, -9e+15  ;;  %v1806_v35 = vsel %vm123_vm9, %v1804_v52, -9e+15  ;;  %v2918_v52 = vpack.c.bf16 %v1939_v39, %v1937_v37  ;;  %v1968_v39 = vld [vmem:[#allocation10 + $0x1c0] sm:$0xff] }
 0xb62   :  { %v1807_v50 = vsel %vm622_vm11, %v1805_v8, -inf  ;;  %v1810_v40 = vsel %vm622_vm11, %v1806_v35, -inf }
 0xb63   :  { %1808 = vmax.xlane.f32.xlu1 %v1807_v50  ;;  %v1938_v50 = vld [vmem:[#allocation10 + $0xd0] sm:$0xff] }
 0xb67   :  { %1811 = vmax.xlane.f32.xlu1 %v1810_v40  ;;  %v1943_v40 = vld [vmem:[#allocation10 + $0xf8] sm:$0xff] }
 0xbf0   :  { %v1809_v51 = vpop.xlane.xlu1 %1808 }
 0xbf1   :  { %v1813_v60 = vsub.f32 %v1805_v8, %v1809_v51  ;;  %v1936_v8 = vld [vmem:[#allocation10 + $0xc0] sm:$0xff] }
 0xbf2   :  { %v2920_v51 = vpack.c.bf16 %v1938_v50, %v1936_v8  ;;  %v1975_v8 = vld [vmem:[#allocation10 + $0x1f8] sm:$0xff] }
 0xbf3   :  { %v1815_v59 = vmul.f32 1.442695, %v1813_v60 }
 0xbf4   :  { %v1812_v54 = vpop.xlane.xlu1 %1811 }
 0xbf5   :  { %3051 = vpow2.f32 %v1815_v59  ;;  %v1814_v55 = vsub.f32 %v1806_v35, %v1812_v54  ;;  %v1941_v35 = vld [vmem:[#allocation10 + $0xe8] sm:$0xff]  ;;  %v1940_v59 = vld [vmem:[#allocation10 + $0xe0] sm:$0xff]  ;;  %v1942_v54 = vld [vmem:[#allocation10 + $0xf0] sm:$0xff] }
 0xbf6   :  { %v2922_v60 = vpack.c.bf16 %v1943_v40, %v1941_v35 }
 0xbf7   :  { %v1817_v42 = vmul.f32 1.442695, %v1814_v55  ;;  %v1945_v55 = vld [vmem:[#allocation10 + $0x108] sm:$0xff] }
 0xbf9   :  { %3053 = vpow2.f32 %v1817_v42  ;;  %v1947_v42 = vld [vmem:[#allocation10 + $0x118] sm:$0xff] }
 0xbff   :  { %v3856_v56 = vpop.eup %3051 }
 0xc00   :  { %v1819_v45 = vsel %vm622_vm11, %v3856_v56, 0.0 }
 0xc01   :  { %1820 = vadd.xlane.f32.xlu1 %v1819_v45  ;;  %v2924_v45 = vpack.c.bf16 %v1942_v54, %v1940_v59 }
 0xc03   :  { %v3860_v57 = vpop.eup %3053 }
 0xc04   :  { %v1822_v44 = vsel %vm622_vm11, %v3860_v57, 0.0 }
 0xc05   :  { %1823 = vadd.xlane.f32.xlu1 %v1822_v44  ;;  %v2926_v44 = vpack.c.bf16 %v1947_v42, %v1945_v55  ;;  %v1972_v42 = vld [vmem:[#allocation10 + $0x1e0] sm:$0xff] }
 0xc09   :  { %2081 = vadd.xlane.f32.xlu1 %v3806_v33  ;;  %v1918_v33 = vld [vmem:[#allocation10 + $0x30] sm:$0xff] }
 0xc0d   :  { %2084 = vadd.xlane.f32.xlu1 %v3818_v6  ;;  %v1923_v6 = vld [vmem:[#allocation10 + $0x58] sm:$0xff] }
 0xc11   :  { %2090 = vadd.xlane.f32.xlu1 %v3828_v53  ;;  %v2900_v53 = vpack.c.bf16 %v1918_v33, %v1916_v34  ;;  %v1955_v34 = vld [vmem:[#allocation10 + $0x158] sm:$0xff]  ;;  %v2932_v33 = vpack.c.bf16 %v1950_v32, %v1948_v17 }
 0xc13   :  { %2901 = vmatpush1.bf16.msra.mxu1 %v2900_v53  ;;  %v1954_v53 = vld [vmem:[#allocation10 + $0x150] sm:$0xff] }
 0xc15   :  { %2093 = vadd.xlane.f32.xlu1 %v3832_v58  ;;  %v2902_v58 = vpack.c.bf16 %v1923_v6, %v1921_v38  ;;  %v2934_v38 = vpack.c.bf16 %v1955_v34, %v1953_v26  ;;  %v1952_v6 = vld [vmem:[#allocation10 + $0x140] sm:$0xff] }
 0xc17   :  { %2903 = vmatprep.subr.bf16.mxu1 %v2902_v58  ;;  %v1957_v58 = vld [vmem:[#allocation10 + $0x168] sm:$0xff] }
 0xc19   :  { %2096 = vadd.xlane.f32.xlu1 %v2095_v36  ;;  %v1920_v36 = vld [vmem:[#allocation10 + $0x40] sm:$0xff] }
 0xc1a   :  { %v2904_v9 = vpack.c.bf16 %v1922_v20, %v1920_v36  ;;  %v1959_v36 = vld [vmem:[#allocation10 + $0x178] sm:$0xff]  ;;  %v2936_v20 = vpack.c.bf16 %v1954_v53, %v1952_v6 }
 0xc1b   :  { %v2938_v0 = vpack.c.bf16 %v1959_v36, %v1957_v58 }
 0xc1c   :  { %2905 = vmatpush1.bf16.msra.mxu1 %v2904_v9  ;;  %v1958_v9 = vld [vmem:[#allocation10 + $0x170] sm:$0xff] }
 0xc1d   :  { %2099 = vadd.xlane.f32.xlu1 %v2098_v11  ;;  %v1924_v11 = vld [vmem:[#allocation10 + $0x60] sm:$0xff]  ;;  %2907 = vmatprep.subr.bf16.mxu1 %v2906_v10  ;;  %v1961_v10 = vld [vmem:[#allocation10 + $0x188] sm:$0xff] }
 0xc1e   :  { %v2908_v16 = vpack.c.bf16 %v1926_v12, %v1924_v11  ;;  %v1963_v11 = vld [vmem:[#allocation10 + $0x198] sm:$0xff]  ;;  %v2940_v12 = vpack.c.bf16 %v1958_v9, %v1956_v3 }
 0xc1f   :  { %v2942_v22 = vpack.c.bf16 %v1963_v11, %v1961_v10  ;;  %v2088_v10 = vpop.xlane.xlu0 %2087 }
 0xc20   :  { %2909 = vmatpush1.bf16.msra.mxu1 %v2908_v16  ;;  %v1962_v16 = vld [vmem:[#allocation10 + $0x190] sm:$0xff] }
 0xc21   :  { %2102 = vadd.xlane.f32.xlu1 %v2101_v46  ;;  %v1935_v46 = vld [vmem:[#allocation10 + $0xb8] sm:$0xff]  ;;  %2911 = vmatprep.subr.bf16.mxu1 %v2910_v18  ;;  %v1965_v18 = vld [vmem:[#allocation10 + $0x1a8] sm:$0xff]  ;;  %v2944_v43 = vpack.c.bf16 %v1962_v16, %v1960_v15 }
 0xc22   :  { %v2914_v49 = vpack.c.bf16 %v1935_v46, %v1933_v25  ;;  %v2946_v25 = vpack.c.bf16 %v1967_v19, %v1965_v18  ;;  %v1964_v46 = vld [vmem:[#allocation10 + $0x1a0] sm:$0xff] }
 0xc24   :  { %2913 = vmatpush1.bf16.msra.mxu1 %v2912_v41  ;;  %v1966_v41 = vld [vmem:[#allocation10 + $0x1b0] sm:$0xff] }
 0xc25   :  { %2915 = vmatprep.subr.bf16.mxu1 %v2914_v49  ;;  %v1969_v49 = vld [vmem:[#allocation10 + $0x1c8] sm:$0xff]  ;;  %v2948_v29 = vpack.c.bf16 %v1966_v41, %v1964_v46 }
 0xc26   :  { %v2950_v37 = vpack.c.bf16 %v1971_v2, %v1969_v49 }
 0xc28   :  { %2917 = vmatpush1.bf16.msra.mxu1 %v2916_v13  ;;  %v1970_v13 = vld [vmem:[#allocation10 + $0x1d0] sm:$0xff] }
 0xc29   :  { %2919 = vmatprep.subr.bf16.mxu1 %v2918_v52  ;;  %v1973_v52 = vld [vmem:[#allocation10 + $0x1e8] sm:$0xff]  ;;  %v2952_v50 = vpack.c.bf16 %v1970_v13, %v1968_v39 }
 0xc2a   :  { %v2954_v35 = vpack.c.bf16 %v1975_v8, %v1973_v52 }
 0xc2c   :  { %2921 = vmatpush1.bf16.msra.mxu1 %v2920_v51 }
 0xc2d   :  { %2923 = vmatprep.subr.bf16.mxu1 %v2922_v60 }
 0xc30   :  { %2925 = vmatpush1.bf16.msra.mxu1 %v2924_v45  ;;  %v1974_v45 = vld [vmem:[#allocation10 + $0x1f0] sm:$0xff] }
 0xc31   :  { %2927 = vmatprep.subr.bf16.mxu1 %v2926_v44  ;;  %v2956_v44 = vpack.c.bf16 %v1974_v45, %v1972_v42 }
 0xc34   :  { %2929 = vmatpush1.bf16.msra.mxu1 %v2928_v27 }
 0xc35   :  { %2931 = vmatprep.subr.bf16.mxu1 %v2930_v28 }
 0xc38   :  { %2933 = vmatpush1.bf16.msra.mxu1 %v2932_v33 }
 0xc39   :  { %2935 = vmatprep.subr.bf16.mxu1 %v2934_v38 }
 0xc3c   :  { %2937 = vmatpush1.bf16.msra.mxu1 %v2936_v20 }
 0xc3d   :  { %2939 = vmatprep.subr.bf16.mxu1 %v2938_v0 }
 0xc40   :  { %2941 = vmatpush1.bf16.msra.mxu1 %v2940_v12 }
 0xc41   :  { %2943 = vmatprep.subr.bf16.mxu1 %v2942_v22 }
 0xc44   :  { %2945 = vmatpush1.bf16.msra.mxu1 %v2944_v43 }
 0xc45   :  { %2947 = vmatprep.subr.bf16.mxu1 %v2946_v25 }
 0xc48   :  { %2949 = vmatpush1.bf16.msra.mxu1 %v2948_v29 }
 0xc49   :  { %2951 = vmatprep.subr.bf16.mxu1 %v2950_v37 }
 0xc4c   :  { %2953 = vmatpush1.bf16.msra.mxu1 %v2952_v50 }
 0xc4d   :  { %2955 = vmatprep.subr.bf16.mxu1 %v2954_v35 }
 0xc50   :  { %2957 = vmatpush1.bf16.msra.mxu1 %v2956_v44 }
 0xc8e   :  { %v1821_v40 = vpop.xlane.xlu1 %1820 }
 0xc8f   :  { %3055 = vrcp.f32 %v1821_v40 }
 0xc92   :  { %v1824_v51 = vpop.xlane.xlu1 %1823 }
 0xc93   :  { %3057 = vrcp.f32 %v1824_v51 }
 0xc96   :  { %v2082_v53 = vpop.xlane.xlu1 %2081 }
 0xc99   :  { %v3056_v60 = vpop.eup %3055 }
 0xc9a   :  { %v1826_v59 = vmul.f32 %v3056_v60, %v3856_v56  ;;  %v2085_v58 = vpop.xlane.xlu1 %2084 }
 0xc9c   :  { %2524 = vmatmul.mubr.msk.f32.vlgmr.msra.gmra.mrb[58].mxu0 %vm622_vm11, %v1826_v59 }
 0xc9d   :  { %v3058_v54 = vpop.eup %3057  ;;  %1905 = vmatprep.mubr.f32.mxu0 %v3240_v5 }
 0xc9e   :  { %v1828_v55 = vmul.f32 %v3058_v54, %v3860_v57  ;;  %v2523_v57 = vld [vmem:[%s3985_s10 + $0x2] ss:$8 sm:$0x3]  ;;  %v2091_v36 = vpop.xlane.xlu1 %2090 }
 0xc9f   :  { %v2112_v28 = vrot.slane %v2523_v57, %v3514_v1  ;;  %v2108_v6 = vrot.slane %v2523_v57, %v3523_v4 }
 0xca0   :  { %2525 = vmatmul.mubr.msk.f32.gmra.mrb[60].mxu0 %vm622_vm11, %v1828_v55 }
 0xca1   :  { %2179 = vmatprep.mubr.f32.mxu0 %v2112_v28 }
 0xca2   :  { %v2094_v1 = vpop.xlane.xlu1 %2093 }
 0xca6   :  { %v2097_v20 = vpop.xlane.xlu1 %2096 }
 0xcaa   :  { %v2100_v11 = vpop.xlane.xlu1 %2099 }
 0xcae   :  { %v2103_v35 = vpop.xlane.xlu1 %2102 }
 0xd6f   :  { %v1901_v61 = vpop.f32.mrb[58].mxu0 }
 0xd70   :  { %v1903_v62 = vpop.f32.mrb[59].mxu0 }
 0xd71   :  { %2040 = vmatprep.mubr.f32.mxu1 %v1903_v62 }
 0xd72   :  { %2041 = vmatmul.mubr.f32.vlgmr.msra.gmra.mrb[36].mxu1 %v1901_v61 }
 0xd73   :  { %v1907_v63 = vpop.f32.mrb[60].mxu0 }
 0xd74   :  { %v2964_v7 = vpack.c.bf16 %v1907_v63, %v1901_v61  ;;  %v1909_v56 = vpop.f32.mrb[61].mxu0 }
 0xd75   :  { %v2962_v27 = vpack.c.bf16 %v1909_v56, %v1903_v62  ;;  %2046 = vmatprep.mubr.f32.mxu1 %v1909_v56 }
 0xd76   :  { %2047 = vmatmul.mubr.f32.gmra.mrb[38].mxu1 %v1907_v63 }
 0xe45   :  { %v2042_v17 = vpop.f32.mrb[36].mxu1 }
 0xe46   :  { %v2044_v32 = vpop.f32.mrb[37].mxu1 }
 0xe49   :  { %v2048_v26 = vpop.f32.mrb[38].mxu1 }
 0xe4a   :  { %v2960_v34 = vpack.c.bf16 %v2048_v26, %v2042_v17  ;;  %v2050_v33 = vpop.f32.mrb[39].mxu1 }
 0xe4b   :  { %v2958_v38 = vpack.c.bf16 %v2050_v33, %v2044_v32 }
 0xe4d   :  { %2959 = vmatprep.subr.bf16.mxu0 %v2958_v38 }
 0xe4e   :  { %2961 = vmatpush1.bf16.xpose.msra.mxu0 %v2960_v34 }
 0xe4f   :  { %2963 = vmatprep.subr.bf16.mxu0 %v2962_v27 }
 0xe55   :  { %2180 = vmatmul.mubr.f32.vlgmr.msra.gmra.mrb[62].mxu0 %v2108_v6 }
 0xe56   :  { %2965 = vmatpush1.bf16.msra.mxu0 %v2964_v7  ;;  %2405 = vmatprep.mubr.f32.mxu0 %v3240_v5 }
 0xf28   :  { %v2181_v0 = vpop.f32.mrb[62].mxu0 }
 0xf29   :  { %v2188_v3 = vrot.slane %v2181_v0, %v3523_v4  ;;  %v2183_v9 = vpop.f32.mrb[63].mxu0 }
 0xf2b   :  { %v2191_v12 = vadd.f32 %v2188_v3, %v2088_v10  ;;  %v2189_v22 = vadd.f32 %v2188_v3, %v2082_v53  ;;  %v2193_v15 = vadd.f32 %v2188_v3, %v2094_v1  ;;  %v2190_v16 = vadd.f32 %v2188_v3, %v2085_v58 }
 0xf2c   :  { %v2195_v18 = vadd.f32 %v2188_v3, %v2100_v11  ;;  %v2192_v19 = vadd.f32 %v2188_v3, %v2091_v36  ;;  %v2194_v43 = vadd.f32 %v2188_v3, %v2097_v20  ;;  %v2196_v30 = vadd.f32 %v2188_v3, %v2103_v35 }
 0xf2d   :  { %vm2199_vm9 = vcmp.gt.f32.partialorder %v2191_v12, 0.0  ;;  %v2207_v25 = vmul.f32 0.2, %v2191_v12  ;;  %vm2197_vm10 = vcmp.gt.f32.partialorder %v2189_v22, 0.0  ;;  %v2205_v46 = vmul.f32 0.2, %v2189_v22 }
 0xf2e   :  { %vm2201_vm11 = vcmp.gt.f32.partialorder %v2193_v15, 0.0  ;;  %v2209_v41 = vmul.f32 0.2, %v2193_v15  ;;  %vm2198_vm6 = vcmp.gt.f32.partialorder %v2190_v16, 0.0  ;;  %v2206_v49 = vmul.f32 0.2, %v2190_v16 }
 0xf2f   :  { %v2215_v2 = vsel %vm2199_vm9, %v2191_v12, %v2207_v25  ;;  %v2213_v4 = vsel %vm2197_vm10, %v2189_v22, %v2205_v46  ;;  %vm2203_vm1 = vcmp.gt.f32.partialorder %v2195_v18, 0.0  ;;  %v2211_v29 = vmul.f32 0.2, %v2195_v18 }
 0xf30   :  { %v2223_v37 = vsel %vm134_vm15, %v2215_v2, -9e+15  ;;  %v2221_v39 = vsel %vm132_vm12, %v2213_v4, -9e+15  ;;  %v2217_v13 = vsel %vm2201_vm11, %v2193_v15, %v2209_v41  ;;  %v2214_v52 = vsel %vm2198_vm6, %v2190_v16, %v2206_v49 }
 0xf31   :  { %v2235_v8 = vsel %vm1045_vm13, %v2223_v37, -inf  ;;  %v2229_v50 = vsel %vm1045_vm13, %v2221_v39, -inf  ;;  %v2225_v40 = vsel %vm136_vm7, %v2217_v13, -9e+15  ;;  %v2222_v51 = vsel %vm133_vm14, %v2214_v52, -9e+15 }
 0xf32   :  { %2236 = vmax.xlane.f32.xlu0 %v2235_v8  ;;  %2230 = vmax.xlane.f32.xlu1 %v2229_v50  ;;  %vm2200_vm2 = vcmp.gt.f32.partialorder %v2192_v19, 0.0  ;;  %v2219_v31 = vsel %vm2203_vm1, %v2195_v18, %v2211_v29  ;;  %v2208_v60 = vmul.f32 0.2, %v2192_v19  ;;  %vm2202_vm12 = vcmp.gt.f32.partialorder %v2194_v43, 0.0 }
 0xf33   :  { %v2210_v59 = vmul.f32 0.2, %v2194_v43  ;;  %v2241_v54 = vsel %vm1045_vm13, %v2225_v40, -inf  ;;  %v2232_v55 = vsel %vm1045_vm13, %v2222_v51, -inf  ;;  %v2227_v23 = vsel %vm138_vm3, %v2219_v31, -9e+15 }
 0xf34   :  { %v2216_v42 = vsel %vm2200_vm2, %v2192_v19, %v2208_v60  ;;  %v2212_v44 = vmul.f32 0.2, %v2196_v30  ;;  %vm2204_vm14 = vcmp.gt.f32.partialorder %v2196_v30, 0.0  ;;  %v2247_v61 = vsel %vm1045_vm13, %v2227_v23, -inf }
 0xf35   :  { %v2224_v21 = vsel %vm135_vm0, %v2216_v42, -9e+15  ;;  %v2218_v45 = vsel %vm2202_vm12, %v2194_v43, %v2210_v59 }
 0xf36   :  { %2242 = vmax.xlane.f32.xlu0 %v2241_v54  ;;  %2233 = vmax.xlane.f32.xlu1 %v2232_v55  ;;  %v2238_v62 = vsel %vm1045_vm13, %v2224_v21, -inf  ;;  %v2226_v63 = vsel %vm137_vm8, %v2218_v45, -9e+15  ;;  %v2220_v7 = vsel %vm2204_vm14, %v2196_v30, %v2212_v44 }
 0xf37   :  { %v2244_v56 = vsel %vm1045_vm13, %v2226_v63, -inf  ;;  %v2228_v14 = vsel %vm139_vm4, %v2220_v7, -9e+15 }
 0xf38   :  { %v2250_v47 = vsel %vm1045_vm13, %v2228_v14, -inf }
 0xf3a   :  { %2248 = vmax.xlane.f32.xlu0 %v2247_v61  ;;  %2239 = vmax.xlane.f32.xlu1 %v2238_v62 }
 0xf3e   :  { %2245 = vmax.xlane.f32.xlu1 %v2244_v56 }
 0xf42   :  { %2251 = vmax.xlane.f32.xlu1 %v2250_v47 }
 0xfbf   :  { %v2237_v27 = vpop.xlane.xlu0 %2236  ;;  %v2231_v57 = vpop.xlane.xlu1 %2230 }
 0xfc0   :  { %v2255_v28 = vsub.f32 %v2223_v37, %v2237_v27  ;;  %v2253_v17 = vsub.f32 %v2221_v39, %v2231_v57 }
 0xfc2   :  { %v2261_v32 = vmul.f32 1.442695, %v2253_v17  ;;  %v2265_v26 = vmul.f32 1.442695, %v2255_v28 }
 0xfc3   :  { %v2243_v34 = vpop.xlane.xlu0 %2242  ;;  %v2234_v33 = vpop.xlane.xlu1 %2233 }
 0xfc4   :  { %v2257_v24 = vsub.f32 %v2225_v40, %v2243_v34  ;;  %v2254_v38 = vsub.f32 %v2222_v51, %v2234_v33  ;;  %3059 = vpow2.f32 %v2261_v32 }
 0xfc5   :  { %3061 = vpow2.f32 %v2265_v26 }
 0xfc6   :  { %v2263_v6 = vmul.f32 1.442695, %v2254_v38  ;;  %v2269_v53 = vmul.f32 1.442695, %v2257_v24 }
 0xfc7   :  { %v2249_v58 = vpop.xlane.xlu0 %2248  ;;  %v2240_v48 = vpop.xlane.xlu1 %2239 }
 0xfc8   :  { %v2259_v36 = vsub.f32 %v2227_v23, %v2249_v58  ;;  %v2256_v1 = vsub.f32 %v2224_v21, %v2240_v48  ;;  %3063 = vpow2.f32 %v2263_v6 }
 0xfc9   :  { %3065 = vpow2.f32 %v2269_v53 }
 0xfca   :  { %v2267_v20 = vmul.f32 1.442695, %v2256_v1  ;;  %v2273_v0 = vmul.f32 1.442695, %v2259_v36 }
 0xfcb   :  { %v2246_v3 = vpop.xlane.xlu1 %2245 }
 0xfcc   :  { %v2258_v9 = vsub.f32 %v2226_v63, %v2246_v3  ;;  %3067 = vpow2.f32 %v2267_v20 }
 0xfcd   :  { %3069 = vpow2.f32 %v2273_v0 }
 0xfce   :  { %v2271_v10 = vmul.f32 1.442695, %v2258_v9  ;;  %v3060_v11 = vpop.eup %3059 }
 0xfcf   :  { %v2252_v12 = vpop.xlane.xlu1 %2251  ;;  %v2277_v15 = vsel %vm1045_vm13, %v3060_v11, 0.0  ;;  %v3062_v16 = vpop.eup %3061 }
 0xfd0   :  { %3071 = vpow2.f32 %v2271_v10  ;;  %v2260_v22 = vsub.f32 %v2228_v14, %v2252_v12  ;;  %2278 = vadd.xlane.f32.xlu0 %v2277_v15  ;;  %v2283_v43 = vsel %vm1045_vm13, %v3062_v16, 0.0 }
 0xfd2   :  { %v2275_v18 = vmul.f32 1.442695, %v2260_v22  ;;  %v3064_v19 = vpop.eup %3063 }
 0xfd3   :  { %v2280_v25 = vsel %vm1045_vm13, %v3064_v19, 0.0  ;;  %v3066_v46 = vpop.eup %3065 }
 0xfd4   :  { %3073 = vpow2.f32 %v2275_v18  ;;  %2284 = vadd.xlane.f32.xlu0 %v2283_v43  ;;  %2281 = vadd.xlane.f32.xlu1 %v2280_v25  ;;  %v2289_v49 = vsel %vm1045_vm13, %v3066_v46, 0.0 }
 0xfd6   :  { %v3068_v41 = vpop.eup %3067 }
 0xfd7   :  { %v2286_v2 = vsel %vm1045_vm13, %v3068_v41, 0.0  ;;  %v3070_v4 = vpop.eup %3069 }
 0xfd8   :  { %2290 = vadd.xlane.f32.xlu0 %v2289_v49  ;;  %2287 = vadd.xlane.f32.xlu1 %v2286_v2  ;;  %v2295_v39 = vsel %vm1045_vm13, %v3070_v4, 0.0 }
 0xfda   :  { %v3072_v29 = vpop.eup %3071 }
 0xfdb   :  { %v2292_v37 = vsel %vm1045_vm13, %v3072_v29, 0.0 }
 0xfdc   :  { %2296 = vadd.xlane.f32.xlu0 %v2295_v39  ;;  %2293 = vadd.xlane.f32.xlu1 %v2292_v37 }
 0xfde   :  { %v3074_v13 = vpop.eup %3073 }
 0xfdf   :  { %v2298_v52 = vsel %vm1045_vm13, %v3074_v13, 0.0 }
 0xfe0   :  { %2299 = vadd.xlane.f32.xlu1 %v2298_v52 }
0x105d   :  { %v2279_v8 = vpop.xlane.xlu0 %2278 }
0x105e   :  { %3075 = vrcp.f32 %v2279_v8 }
0x1061   :  { %v2282_v50 = vpop.xlane.xlu1 %2281  ;;  %v2285_v35 = vpop.xlane.xlu0 %2284 }
0x1062   :  { %3077 = vrcp.f32 %v2282_v50 }
0x1063   :  { %3079 = vrcp.f32 %v2285_v35 }
0x1065   :  { %v2288_v40 = vpop.xlane.xlu1 %2287  ;;  %v2291_v60 = vpop.xlane.xlu0 %2290 }
0x1066   :  { %3081 = vrcp.f32 %v2288_v40 }
0x1067   :  { %3083 = vrcp.f32 %v2291_v60 }
0x1068   :  { %v3076_v51 = vpop.eup %3075 }
0x1069   :  { %v2302_v31 = vmul.f32 %v3076_v51, %v3060_v11  ;;  %v2294_v59 = vpop.xlane.xlu1 %2293  ;;  %v2297_v42 = vpop.xlane.xlu0 %2296 }
0x106a   :  { %3085 = vrcp.f32 %v2294_v59 }
0x106b   :  { %2526 = vmatmul.mubr.msk.f32.vlgmr.msra.gmra.mrb[64].mxu0 %vm1045_vm13, %v2302_v31  ;;  %3087 = vrcp.f32 %v2297_v42 }
0x106c   :  { %2411 = vmatprep.mubr.f32.mxu0 %v3240_v5  ;;  %v3078_v30 = vpop.eup %3077 }
0x106d   :  { %v2304_v54 = vmul.f32 %v3078_v30, %v3064_v19  ;;  %v3080_v55 = vpop.eup %3079  ;;  %v2300_v45 = vpop.xlane.xlu1 %2299 }
0x106e   :  { %v2306_v23 = vmul.f32 %v3080_v55, %v3062_v16  ;;  %3089 = vrcp.f32 %v2300_v45 }
0x106f   :  { %2527 = vmatmul.mubr.msk.f32.gmra.mrb[66].mxu0 %vm1045_vm13, %v2304_v54 }
0x1070   :  { %2417 = vmatprep.mubr.f32.mxu0 %v3240_v5  ;;  %v3082_v21 = vpop.eup %3081 }
0x1071   :  { %v2308_v44 = vmul.f32 %v3082_v21, %v3068_v41  ;;  %v3084_v61 = vpop.eup %3083 }
0x1072   :  { %v2310_v62 = vmul.f32 %v3084_v61, %v3066_v46 }
0x1073   :  { %2528 = vmatmul.mubr.msk.f32.gmra.mrb[68].mxu0 %vm1045_vm13, %v2306_v23 }
0x1074   :  { %2423 = vmatprep.mubr.f32.mxu0 %v3240_v5  ;;  %v3086_v63 = vpop.eup %3085 }
0x1075   :  { %v2312_v7 = vmul.f32 %v3086_v63, %v3072_v29  ;;  %v3088_v56 = vpop.eup %3087 }
0x1076   :  { %v2314_v14 = vmul.f32 %v3088_v56, %v3070_v4 }
0x1077   :  { %2529 = vmatmul.mubr.msk.f32.gmra.mrb[70].mxu0 %vm1045_vm13, %v2308_v44 }
0x1078   :  { %2429 = vmatprep.mubr.f32.mxu0 %v3240_v5  ;;  %v3090_v47 = vpop.eup %3089 }
0x1079   :  { %v2316_v27 = vmul.f32 %v3090_v47, %v3074_v13 }
0x107b   :  { %2530 = vmatmul.mubr.msk.f32.gmra.mrb[72].mxu0 %vm1045_vm13, %v2310_v62 }
0x107c   :  { %2435 = vmatprep.mubr.f32.mxu0 %v3240_v5 }
0x107f   :  { %2531 = vmatmul.mubr.msk.f32.gmra.mrb[74].mxu0 %vm1045_vm13, %v2312_v7 }
0x1080   :  { %2441 = vmatprep.mubr.f32.mxu0 %v3240_v5 }
0x1083   :  { %2532 = vmatmul.mubr.msk.f32.gmra.mrb[76].mxu0 %vm1045_vm13, %v2314_v14 }
0x1084   :  { %2447 = vmatprep.mubr.f32.mxu0 %v3240_v5 }
0x1087   :  { %2533 = vmatmul.mubr.msk.f32.gmra.mrb[78].mxu0 %vm1045_vm13, %v2316_v27 }
0x113e   :  { %v2407_v57 = vpop.f32.mrb[64].mxu0 }
0x113f   :  { %2454 = vst [vmem:[%s3986_s11] sm:$0xff] %v2407_v57  ;;  %v2409_v28 = vpop.f32.mrb[65].mxu0 }
0x1140   :  { %2455 = vst [vmem:[%s3986_s11 + $0x8] sm:$0xff] %v2409_v28 }
0x1142   :  { %v2413_v17 = vpop.f32.mrb[66].mxu0 }
0x1143   :  { %2456 = vst [vmem:[%s3986_s11 + $0x10] sm:$0xff] %v2413_v17  ;;  %v2415_v32 = vpop.f32.mrb[67].mxu0 }
0x1144   :  { %2457 = vst [vmem:[%s3986_s11 + $0x18] sm:$0xff] %v2415_v32 }
0x1146   :  { %v2419_v5 = vpop.f32.mrb[68].mxu0 }
0x1147   :  { %2458 = vst [vmem:[%s3986_s11 + $0x20] sm:$0xff] %v2419_v5  ;;  %v2421_v26 = vpop.f32.mrb[69].mxu0 }
0x1148   :  { %2459 = vst [vmem:[%s3986_s11 + $0x28] sm:$0xff] %v2421_v26 }
0x114a   :  { %v2425_v34 = vpop.f32.mrb[70].mxu0 }
0x114b   :  { %2460 = vst [vmem:[%s3986_s11 + $0x30] sm:$0xff] %v2425_v34  ;;  %v2427_v33 = vpop.f32.mrb[71].mxu0 }
0x114c   :  { %2461 = vst [vmem:[%s3986_s11 + $0x38] sm:$0xff] %v2427_v33 }
0x114e   :  { %v2431_v24 = vpop.f32.mrb[72].mxu0 }
0x114f   :  { %2462 = vst [vmem:[%s3986_s11 + $0x40] sm:$0xff] %v2431_v24  ;;  %v2433_v38 = vpop.f32.mrb[73].mxu0 }
0x1150   :  { %2463 = vst [vmem:[%s3986_s11 + $0x48] sm:$0xff] %v2433_v38 }
0x1152   :  { %v2437_v6 = vpop.f32.mrb[74].mxu0 }
0x1153   :  { %2464 = vst [vmem:[%s3986_s11 + $0x50] sm:$0xff] %v2437_v6  ;;  %v2439_v53 = vpop.f32.mrb[75].mxu0 }
0x1154   :  { %2465 = vst [vmem:[%s3986_s11 + $0x58] sm:$0xff] %v2439_v53 }
0x1156   :  { %v2443_v58 = vpop.f32.mrb[76].mxu0 }
0x1157   :  { %2466 = vst [vmem:[%s3986_s11 + $0x60] sm:$0xff] %v2443_v58  ;;  %v2445_v48 = vpop.f32.mrb[77].mxu0 }
0x1158   :  { %2467 = vst [vmem:[%s3986_s11 + $0x68] sm:$0xff] %v2445_v48 }
0x115a   :  { %v2449_v36 = vpop.f32.mrb[78].mxu0 }
0x115b   :  { %2468 = vst [vmem:[%s3986_s11 + $0x70] sm:$0xff] %v2449_v36  ;;  %v2451_v1 = vpop.f32.mrb[79].mxu0 }
0x115c   :  { %2469 = vst [vmem:[%s3986_s11 + $0x78] sm:$0xff] %v2451_v1 }
0x115d   :  { %2474 = vsyncpa [#allocation3], 1 }
0x115e   :  { %2475 = vsyncpa [#allocation5], 1 }
0x115f   :  { %2476 = vsyncpa [#allocation8], 1 }
0x1160   :  { %2477 = vsyncpa [#allocation11], 1 }

</bundles_post_ra>
